<compile_context>
chip_gen: v7x
topology: tpu7x:2x2x1
jax: 0.10.0
libtpu: 0.0.40
codegen_flags: <defaults>
</compile_context>

<pallas_src>
import jax
import jax.numpy as jnp
from jax import lax
from jax.experimental import pallas as pl
from jax.experimental.pallas import tpu as pltpu

NEG_INF = -1e30  # matches the standard masked_softmax util used by this model


def _round_up(x, m):
    return ((x + m - 1) // m) * m


def _vmem_limit_bytes():
    # Explicit scoped-VMEM budget: ~100 MiB on 128 MiB parts (v5e/v6e),
    # ~51 MiB on 64 MiB parts (v7x). The defaults (16/32 MiB) force tiny tiles.
    try:
        cap = pltpu.get_tpu_info().vmem_capacity_bytes
    except Exception:
        cap = 64 * 1024 * 1024
    return min(100 * 1024 * 1024, int(cap * 0.8))


def _choose_bt(B, Pc, Lq1, Hp, budget, cap=8):
    # Batch chunk for kernel B: divisor of B, grid length >= 2 when possible
    # (v7x has 2 TensorCores), largest chunk whose estimated footprint fits.
    def footprint(bt):
        blk_in = 2 * bt * Pc * Hp * 2 + 2 * bt * Lq1 * Hp * 2        # cs/qraw dbuf bf16
        blk_out = 2 * 2 * bt * Pc * 4 * Hp * 2                       # gx_f/gx_b dbuf bf16
        wts = 2 * (Hp * Hp + 4 * Hp * 4 * Hp) * 2                    # resident weights
        live = (3 * bt * Pc * Lq1 * 4                                # L / exp / probs f32
                + 3 * bt * Pc * Hp * 4                               # a, s, b f32
                + 2 * bt * Pc * 4 * Hp * 4)                          # f32 gx before cast
        return blk_in + blk_out + wts + live

    divs = [d for d in range(1, B + 1) if B % d == 0 and d <= cap] or [1]
    pref = [d for d in divs if B // d >= 2] or divs
    best = pref[0]
    for d in sorted(pref):
        if footprint(d) <= budget:
            best = d
    return best


def _choose_pt(Pc, B, Hp, budget, cap=256):
    # P-tile for kernel C: multiple of 8 dividing Pc, grid length >= 2 when
    # possible, largest tile fitting the VMEM budget.
    def footprint(pt):
        blk_in = 2 * 2 * B * pt * 4 * Hp * 2          # gx_f/gx_b blocks dbuf bf16
        blk_out = 2 * B * pt * 2 * Hp * 4             # merged h output dbuf f32
        live = 2 * pt * 4 * Hp * 4 + 4 * pt * Hp * 4  # gates + carries f32
        wts = 2 * 2 * Hp * 4 * Hp * 2                 # whh_f / whh_b
        return blk_in + blk_out + live + wts

    cands = [p for p in range(8, min(cap, Pc) + 1, 8) if Pc % p == 0] or [Pc]
    pref = [p for p in cands if Pc // p >= 2] or cands
    best = pref[0]
    for p in sorted(pref):
        if footprint(p) <= budget:
            best = p
    return best


# --------------------------------------------------------------------------- B
def _coattn_gx_kernel(cs_ref, qraw_ref, qsent_ref, cmask_ref, qmask_ref,
                      wq_ref, bq_ref,
                      wfs_ref, wfa_ref, bf_ref,
                      wbs_ref, wba_ref, bb_ref,
                      gxf_ref, gxb_ref):
    f32, bf16 = jnp.float32, jnp.bfloat16

    cs = cs_ref[...]                       # (Bt, Pc,  Hp) bf16, zero-padded rows/cols
    qraw = qraw_ref[...]                   # (Bt, Lq1, Hp) bf16, last row zeros
    Lq1 = qraw.shape[1]

    # fused q projection: tanh(q @ Wq^T + b); sentinel replaces the last row
    qp = jnp.tanh(
        jnp.einsum('bqh,hk->bqk', qraw, wq_ref[...], preferred_element_type=f32)
        + bq_ref[...])
    row = lax.broadcasted_iota(jnp.int32, qp.shape, 1)
    qs = jnp.where(row == Lq1 - 1, qsent_ref[...], qp).astype(bf16)

    # affinity L = cs @ qs^T -> (Bt, Pc, Lq1), f32 accumulation on the MXU
    L = jnp.einsum('bch,bqh->bcq', cs, qs, preferred_element_type=f32)

    cmask = cmask_ref[...] > 0.0           # (Bt, Pc, 1)
    qmask = qmask_ref[...] > 0.0           # (Bt, 1, Lq1)

    # betas first (masked softmax over the context dim, axis 1); temporaries
    # retire before the alphas path, shrinking peak vreg/VMEM pressure.
    lc = jnp.where(cmask, L, NEG_INF)
    lc = lc - jnp.max(lc, axis=1, keepdims=True)
    ec = jnp.exp(lc)
    betas = (ec * pl.reciprocal(jnp.sum(ec, axis=1, keepdims=True),
                                approx=True)).astype(bf16)
    b = jnp.einsum('bcq,bch->bqh', betas, cs, preferred_element_type=f32)  # (Bt,Lq1,Hp)

    # alphas (masked softmax over the question dim, axis 2)
    lq = jnp.where(qmask, L, NEG_INF)
    lq = lq - jnp.max(lq, axis=2, keepdims=True)
    eq = jnp.exp(lq)
    alphas = (eq * pl.reciprocal(jnp.sum(eq, axis=2, keepdims=True),
                                 approx=True)).astype(bf16)
    a = jnp.einsum('bcq,bqh->bch', alphas, qs, preferred_element_type=f32)  # (Bt,Pc,Hp)
    s = jnp.einsum('bcq,bqh->bch', alphas, b.astype(bf16),
                   preferred_element_type=f32)                              # (Bt,Pc,Hp)

    # Hoisted LSTM input projection:  x = [s ; a],  gx = x @ Wih^T + (b_ih+b_hh)
    #   = s @ Wih^T[:H] + a @ Wih^T[H:]   (split weights avoid an in-kernel concat)
    # f32 accumulation, bf16 on store (halves the HBM round trip to kernel C).
    s_b = s.astype(bf16)
    a_b = a.astype(bf16)
    gxf_ref[...] = (
        jnp.einsum('bch,hg->bcg', s_b, wfs_ref[...], preferred_element_type=f32)
        + jnp.einsum('bch,hg->bcg', a_b, wfa_ref[...], preferred_element_type=f32)
        + bf_ref[...]).astype(gxf_ref.dtype)
    gxb_ref[...] = (
        jnp.einsum('bch,hg->bcg', s_b, wbs_ref[...], preferred_element_type=f32)
        + jnp.einsum('bch,hg->bcg', a_b, wba_ref[...], preferred_element_type=f32)
        + bb_ref[...]).astype(gxb_ref.dtype)


# --------------------------------------------------------------------------- C
def _bilstm_kernel(gxf_ref, gxb_ref, whhf_ref, whhb_ref, out_ref):
    # Recurrence over dim 0 (= original batch dim, matching batch_first=False).
    # The P-tile given by the grid is the LSTM "batch". Forward and backward
    # chains are interleaved in a single unrolled fori_loop so the two
    # independent recurrences hide each other's MXU/VPU/EUP latency.
    T = gxf_ref.shape[0]
    Pt = gxf_ref.shape[1]
    Hp = whhf_ref.shape[0]
    f32, bf16 = jnp.float32, jnp.bfloat16

    def cell(gates, c_prev):
        i = jax.nn.sigmoid(gates[:, 0:Hp])
        f = jax.nn.sigmoid(gates[:, Hp:2 * Hp])
        g = jnp.tanh(gates[:, 2 * Hp:3 * Hp])
        o = jax.nn.sigmoid(gates[:, 3 * Hp:4 * Hp])
        c_new = f * c_prev + i * g
        h_new = o * jnp.tanh(c_new)
        return h_new, c_new

    def body(t, carry):
        hf, cf, hb, cb = carry
        tb = T - 1 - t
        gf = gxf_ref[t].astype(f32) + jnp.dot(hf.astype(bf16), whhf_ref[...],
                                              preferred_element_type=f32)
        gb = gxb_ref[tb].astype(f32) + jnp.dot(hb.astype(bf16), whhb_ref[...],
                                               preferred_element_type=f32)
        hf, cf = cell(gf, cf)
        hb, cb = cell(gb, cb)
        # merged output: forward half in [:, :Hp], backward half in [:, Hp:]
        out_ref[t, :, pl.ds(0, Hp)] = hf
        out_ref[tb, :, pl.ds(Hp, Hp)] = hb
        return hf, cf, hb, cb

    z = jnp.zeros((Pt, Hp), f32)
    unroll = T if T <= 8 else 4
    lax.fori_loop(0, T, body, (z, z, z, z), unroll=unroll)


# ----------------------------------------------------------------------- glue
def coattention_forward(c, q, c_mask, q_mask, params, *, bt_cap=8, pt_cap=256):
    B, Lc, H = c.shape
    Lq = q.shape[1]
    f32, bf16 = jnp.float32, jnp.bfloat16

    Hp = _round_up(H, 128)            # lane-dense hidden dim (zero pad is exact)
    P = Lc + 1
    Lq1 = Lq + 1
    Pc = _round_up(P, 8)

    vmem_limit = _vmem_limit_bytes()
    budget = int(vmem_limit * 0.8)
    Bt = _choose_bt(B, Pc, Lq1, Hp, budget, cap=bt_cap)
    Pt = _choose_pt(Pc, B, Hp, budget, cap=pt_cap)

    # ---- activations: pad H -> Hp, append sentinel/zero rows, pad P -> Pc ----
    c_p = jnp.pad(c.astype(bf16), ((0, 0), (0, 0), (0, Hp - H)))
    q_p = jnp.pad(q.astype(bf16), ((0, 0), (0, 0), (0, Hp - H)))
    c_sent = jnp.pad(params["c_sentinel"][:, 0], (0, Hp - H)).astype(bf16)
    q_sent = jnp.pad(params["q_sentinel"][:, 0], (0, Hp - H)).astype(f32)
    q_sent = q_sent.reshape(1, 1, Hp)

    cs = jnp.concatenate(
        [c_p, jnp.broadcast_to(c_sent[None, None, :], (B, 1, Hp))], axis=1)   # (B,P,Hp)
    qraw = jnp.concatenate([q_p, jnp.zeros((B, 1, Hp), bf16)], axis=1)        # (B,Lq1,Hp)
    if Pc != P:
        cs = jnp.pad(cs, ((0, 0), (0, Pc - P), (0, 0)))   # padded rows: mask = 0

    # mask extension: duplicate second-to-last element (exactly as the reference)
    c_mask_f = c_mask.astype(f32)
    q_mask_f = q_mask.astype(f32)
    cmask_ext = jnp.concatenate([c_mask_f, c_mask_f[:, Lc - 2:Lc - 1]], axis=1)
    qmask_ext = jnp.concatenate([q_mask_f, q_mask_f[:, Lq - 2:Lq - 1]], axis=1)
    if Pc != P:
        cmask_ext = jnp.pad(cmask_ext, ((0, 0), (0, Pc - P)))
    cmask3 = cmask_ext[:, :, None]        # (B, Pc, 1)   -> no (8,128) Bt constraint
    qmask3 = qmask_ext[:, None, :]        # (B, 1, Lq1)

    # ---- weights: pad per-gate to Hp, transpose, split x = [s ; a] ----
    wq_T = jnp.pad(params["q_proj_w"], ((0, Hp - H), (0, Hp - H))).T.astype(bf16)
    bq = jnp.pad(params["q_proj_b"], (0, Hp - H)).astype(f32)[None, :]        # (1, Hp)

    def gate_w_T(w):          # (4H, H) -> (Hp, 4Hp), per-gate padded, transposed
        w4 = w.reshape(4, H, H)
        w4 = jnp.pad(w4, ((0, 0), (0, Hp - H), (0, Hp - H)))
        return jnp.transpose(w4, (2, 0, 1)).reshape(Hp, 4 * Hp).astype(bf16)

    def gate_b(b1, b2):       # (4H,)+(4H,) -> (1, 4Hp), per-gate padded
        bb = (b1 + b2).reshape(4, H)
        bb = jnp.pad(bb, ((0, 0), (0, Hp - H)))
        return bb.reshape(1, 4 * Hp).astype(f32)

    wfs = gate_w_T(params["w_ih_f"][:, :H])
    wfa = gate_w_T(params["w_ih_f"][:, H:])
    wbs = gate_w_T(params["w_ih_b"][:, :H])
    wba = gate_w_T(params["w_ih_b"][:, H:])
    bias_f = gate_b(params["b_ih_f"], params["b_hh_f"])
    bias_b = gate_b(params["b_ih_b"], params["b_hh_b"])
    whh_f = gate_w_T(params["w_hh_f"])
    whh_b = gate_w_T(params["w_hh_b"])

    # ---- kernel B: coattention + hoisted LSTM input projection -> gx (bf16) ----
    gx_f, gx_b = pl.pallas_call(
        _coattn_gx_kernel,
        out_shape=(jax.ShapeDtypeStruct((B, Pc, 4 * Hp), bf16),
                   jax.ShapeDtypeStruct((B, Pc, 4 * Hp), bf16)),
        grid=(B // Bt,),
        in_specs=[
            pl.BlockSpec((Bt, Pc, Hp), lambda b: (b, 0, 0)),        # cs
            pl.BlockSpec((Bt, Lq1, Hp), lambda b: (b, 0, 0)),       # q (raw, +zero row)
            pl.BlockSpec((1, 1, Hp), lambda b: (0, 0, 0)),          # q sentinel
            pl.BlockSpec((Bt, Pc, 1), lambda b: (b, 0, 0)),         # cmask
            pl.BlockSpec((Bt, 1, Lq1), lambda b: (b, 0, 0)),        # qmask
            pl.BlockSpec((Hp, Hp), lambda b: (0, 0)),               # Wq^T
            pl.BlockSpec((1, Hp), lambda b: (0, 0)),                # bq
            pl.BlockSpec((Hp, 4 * Hp), lambda b: (0, 0)),           # wfs
            pl.BlockSpec((Hp, 4 * Hp), lambda b: (0, 0)),           # wfa
            pl.BlockSpec((1, 4 * Hp), lambda b: (0, 0)),            # bias_f
            pl.BlockSpec((Hp, 4 * Hp), lambda b: (0, 0)),           # wbs
            pl.BlockSpec((Hp, 4 * Hp), lambda b: (0, 0)),           # wba
            pl.BlockSpec((1, 4 * Hp), lambda b: (0, 0)),            # bias_b
        ],
        out_specs=(pl.BlockSpec((Bt, Pc, 4 * Hp), lambda b: (b, 0, 0)),
                   pl.BlockSpec((Bt, Pc, 4 * Hp), lambda b: (b, 0, 0))),
        compiler_params=pltpu.CompilerParams(
            dimension_semantics=("parallel",),
            vmem_limit_bytes=vmem_limit),
    )(cs, qraw, q_sent, cmask3, qmask3, wq_T, bq,
      wfs, wfa, bias_f, wbs, wba, bias_b)

    # ---- kernel C: BiLSTM recurrence, tiled over the (parallel) P dimension ----
    out = pl.pallas_call(
        _bilstm_kernel,
        out_shape=jax.ShapeDtypeStruct((B, Pc, 2 * Hp), f32),
        grid=(Pc // Pt,),
        in_specs=[
            pl.BlockSpec((B, Pt, 4 * Hp), lambda p: (0, p, 0)),     # gx_f (bf16)
            pl.BlockSpec((B, Pt, 4 * Hp), lambda p: (0, p, 0)),     # gx_b (bf16)
            pl.BlockSpec((Hp, 4 * Hp), lambda p: (0, 0)),           # whh_f
            pl.BlockSpec((Hp, 4 * Hp), lambda p: (0, 0)),           # whh_b
        ],
        out_specs=pl.BlockSpec((B, Pt, 2 * Hp), lambda p: (0, p, 0)),
        compiler_params=pltpu.CompilerParams(
            dimension_semantics=("parallel",),
            vmem_limit_bytes=vmem_limit),
    )(gx_f, gx_b, whh_f, whh_b)

    # TODO(synk): dropout omitted — module evaluated in inference mode (identity).
    # drop sentinel row / P padding / Hp padding; fwd||bwd already concatenated.
    if Hp == H:
        x = out[:, :Lc, :]
    else:
        x = jnp.concatenate([out[:, :Lc, :H], out[:, :Lc, Hp:Hp + H]], axis=-1)
    return x                                                        # (B, Lc, 2H)


def make_params(H, key):
    keys = jax.random.split(key, 12)

    def uni(k, shape, bound):
        return jax.random.uniform(k, shape, jnp.float32, -bound, bound)

    lin_b = 1.0 / (H ** 0.5)
    xav_b = (6.0 / (H + 1)) ** 0.5
    return dict(
        q_proj_w=uni(keys[0], (H, H), lin_b),
        q_proj_b=uni(keys[1], (H,), lin_b),
        c_sentinel=uni(keys[2], (H, 1), xav_b),
        q_sentinel=uni(keys[3], (H, 1), xav_b),
        w_ih_f=uni(keys[4], (4 * H, 2 * H), lin_b),
        w_hh_f=uni(keys[5], (4 * H, H), lin_b),
        b_ih_f=uni(keys[6], (4 * H,), lin_b),
        b_hh_f=uni(keys[7], (4 * H,), lin_b),
        w_ih_b=uni(keys[8], (4 * H, 2 * H), lin_b),
        w_hh_b=uni(keys[9], (4 * H, H), lin_b),
        b_ih_b=uni(keys[10], (4 * H,), lin_b),
        b_hh_b=uni(keys[11], (4 * H,), lin_b),
    )


if __name__ == "__main__":
    B, Lc, Lq, H = 2, 16, 8, 32
    key = jax.random.PRNGKey(0)
    k_p, k_c, k_q = jax.random.split(key, 3)

    params = make_params(H, k_p)
    c = jax.random.normal(k_c, (B, Lc, H), jnp.float32)
    q = jax.random.normal(k_q, (B, Lq, H), jnp.float32)

    c_lens = jnp.array([Lc, Lc - 4])
    q_lens = jnp.array([Lq, Lq - 2])
    c_mask = (jnp.arange(Lc)[None, :] < c_lens[:, None])
    q_mask = (jnp.arange(Lq)[None, :] < q_lens[:, None])

    out = coattention_forward(c, q, c_mask, q_mask, params)
    out = jax.block_until_ready(out)
    assert out.shape == (B, Lc, 2 * H), out.shape
    assert bool(jnp.all(jnp.isfinite(out)))
    print("KERNEL_OK")
</pallas_src>

<mosaic_0001>
module attributes {stable_mosaic.version = 11 : i64} {
  func.func @_coattn_gx_kernel(%arg0: i32, %arg1: memref<1x24x128xbf16, #tpu.memory_space<vmem>>, %arg2: memref<1x9x128xbf16, #tpu.memory_space<vmem>>, %arg3: memref<1x1x128xf32, #tpu.memory_space<vmem>>, %arg4: memref<1x24x1xf32, #tpu.memory_space<vmem>>, %arg5: memref<1x1x9xf32, #tpu.memory_space<vmem>>, %arg6: memref<128x128xbf16, #tpu.memory_space<vmem>>, %arg7: memref<1x128xf32, #tpu.memory_space<vmem>>, %arg8: memref<128x512xbf16, #tpu.memory_space<vmem>>, %arg9: memref<128x512xbf16, #tpu.memory_space<vmem>>, %arg10: memref<1x512xf32, #tpu.memory_space<vmem>>, %arg11: memref<128x512xbf16, #tpu.memory_space<vmem>>, %arg12: memref<128x512xbf16, #tpu.memory_space<vmem>>, %arg13: memref<1x512xf32, #tpu.memory_space<vmem>>, %arg14: memref<1x24x512xbf16, #tpu.memory_space<vmem>>, %arg15: memref<1x24x512xbf16, #tpu.memory_space<vmem>>) attributes {dimension_semantics = [#tpu.dimension_semantics<parallel>], iteration_bounds = array<i64: 2>, scalar_prefetch = 0 : i64, scratch_operands = 0 : i64, tpu.core_type = #tpu.core_type<tc>, window_params = [{transform_indices = @transform_0, window_bounds = array<i64: 1, 24, 128>}, {transform_indices = @transform_1, window_bounds = array<i64: 1, 9, 128>}, {pipeline_mode = #tpu.pipeline_mode<synchronous>, transform_indices = @transform_2, window_bounds = array<i64: 1, 1, 128>}, {transform_indices = @transform_3, window_bounds = array<i64: 1, 24, 1>}, {transform_indices = @transform_4, window_bounds = array<i64: 1, 1, 9>}, {pipeline_mode = #tpu.pipeline_mode<synchronous>, transform_indices = @transform_5, window_bounds = array<i64: 128, 128>}, {pipeline_mode = #tpu.pipeline_mode<synchronous>, transform_indices = @transform_6, window_bounds = array<i64: 1, 128>}, {pipeline_mode = #tpu.pipeline_mode<synchronous>, transform_indices = @transform_7, window_bounds = array<i64: 128, 512>}, {pipeline_mode = #tpu.pipeline_mode<synchronous>, transform_indices = @transform_8, window_bounds = array<i64: 128, 512>}, {pipeline_mode = #tpu.pipeline_mode<synchronous>, transform_indices = @transform_9, window_bounds = array<i64: 1, 512>}, {pipeline_mode = #tpu.pipeline_mode<synchronous>, transform_indices = @transform_10, window_bounds = array<i64: 128, 512>}, {pipeline_mode = #tpu.pipeline_mode<synchronous>, transform_indices = @transform_11, window_bounds = array<i64: 128, 512>}, {pipeline_mode = #tpu.pipeline_mode<synchronous>, transform_indices = @transform_12, window_bounds = array<i64: 1, 512>}, {transform_indices = @transform_13, window_bounds = array<i64: 1, 24, 512>}, {transform_indices = @transform_14, window_bounds = array<i64: 1, 24, 512>}]} {
    %c0 = arith.constant 0 : index
    %c0_0 = arith.constant 0 : index
    %c0_1 = arith.constant 0 : index
    %0 = vector.load %arg1[%c0, %c0_0, %c0_1] : memref<1x24x128xbf16, #tpu.memory_space<vmem>>, vector<1x24x128xbf16>
    %c0_2 = arith.constant 0 : index
    %c0_3 = arith.constant 0 : index
    %c0_4 = arith.constant 0 : index
    %1 = vector.load %arg2[%c0_2, %c0_3, %c0_4] : memref<1x9x128xbf16, #tpu.memory_space<vmem>>, vector<1x9x128xbf16>
    %c0_5 = arith.constant 0 : index
    %c0_6 = arith.constant 0 : index
    %2 = vector.load %arg6[%c0_5, %c0_6] : memref<128x128xbf16, #tpu.memory_space<vmem>>, vector<128x128xbf16>
    "tpu.trace_start"() <{level = 10 : i32, message = "bqh,hk->bqk"}> : () -> ()
    %cst = arith.constant dense<0.000000e+00> : vector<1x9x128xf32>
    %3 = tpu.matmul %1, %2, %cst {dimension_numbers = #tpu.dot_dimension_numbers<[2], [0], [0, 1], [1], [0, 0, 0, 1, 1, 1], [], []>} : vector<1x9x128xbf16>, vector<128x128xbf16>, vector<1x9x128xf32> -> vector<1x9x128xf32>
    "tpu.trace_stop"() : () -> ()
    %c0_7 = arith.constant 0 : index
    %c0_8 = arith.constant 0 : index
    %4 = vector.load %arg7[%c0_7, %c0_8] : memref<1x128xf32, #tpu.memory_space<vmem>>, vector<1x128xf32>
    %5 = vector.shape_cast %4 : vector<1x128xf32> to vector<1x1x128xf32>
    %6 = vector.broadcast %5 : vector<1x1x128xf32> to vector<1x9x128xf32>
    %7 = arith.addf %3, %6 : vector<1x9x128xf32>
    %8 = math.tanh %7 : vector<1x9x128xf32>
    %9 = tpu.iota {dimensions = array<i32: 1>} : vector<1x9x128xi32>
    %c8_i32 = arith.constant 8 : i32
    %10 = vector.broadcast %c8_i32 : i32 to vector<1x9x128xi32>
    %11 = arith.cmpi eq, %9, %10 : vector<1x9x128xi32>
    %c0_9 = arith.constant 0 : index
    %c0_10 = arith.constant 0 : index
    %c0_11 = arith.constant 0 : index
    %12 = vector.load %arg3[%c0_9, %c0_10, %c0_11] : memref<1x1x128xf32, #tpu.memory_space<vmem>>, vector<1x1x128xf32>
    %13 = vector.shape_cast %12 : vector<1x1x128xf32> to vector<1x1x128xf32>
    %14 = vector.broadcast %13 : vector<1x1x128xf32> to vector<1x9x128xf32>
    %15 = arith.select %11, %14, %8 : vector<1x9x128xi1>, vector<1x9x128xf32>
    %16 = arith.truncf %15 : vector<1x9x128xf32> to vector<1x9x128xbf16>
    "tpu.trace_start"() <{level = 10 : i32, message = "bch,bqh->bcq"}> : () -> ()
    %cst_12 = arith.constant dense<0.000000e+00> : vector<1x24x9xf32>
    %17 = tpu.matmul %0, %16, %cst_12 {dimension_numbers = #tpu.dot_dimension_numbers<[2], [2], [1], [1], [0, 0, 0, 1, 1, 1], [0], [0]>} : vector<1x24x128xbf16>, vector<1x9x128xbf16>, vector<1x24x9xf32> -> vector<1x24x9xf32>
    "tpu.trace_stop"() : () -> ()
    %c0_13 = arith.constant 0 : index
    %c0_14 = arith.constant 0 : index
    %c0_15 = arith.constant 0 : index
    %18 = vector.load %arg4[%c0_13, %c0_14, %c0_15] : memref<1x24x1xf32, #tpu.memory_space<vmem>>, vector<1x24x1xf32>
    %cst_16 = arith.constant 0.000000e+00 : f32
    %19 = vector.broadcast %cst_16 : f32 to vector<1x24x1xf32>
    %20 = arith.cmpf ogt, %18, %19 : vector<1x24x1xf32>
    %c0_17 = arith.constant 0 : index
    %c0_18 = arith.constant 0 : index
    %c0_19 = arith.constant 0 : index
    %21 = vector.load %arg5[%c0_17, %c0_18, %c0_19] : memref<1x1x9xf32, #tpu.memory_space<vmem>>, vector<1x1x9xf32>
    %cst_20 = arith.constant 0.000000e+00 : f32
    %22 = vector.broadcast %cst_20 : f32 to vector<1x1x9xf32>
    %23 = arith.cmpf ogt, %21, %22 : vector<1x1x9xf32>
    %cst_21 = arith.constant -1.000000e+30 : f32
    %24 = vector.shape_cast %20 : vector<1x24x1xi1> to vector<1x24x1xi1>
    %25 = vector.broadcast %24 : vector<1x24x1xi1> to vector<1x24x9xi1>
    %26 = vector.broadcast %cst_21 : f32 to vector<1x24x9xf32>
    %27 = arith.select %25, %17, %26 : vector<1x24x9xi1>, vector<1x24x9xf32>
    %cst_22 = arith.constant dense<0xFF800000> : vector<1x9xf32>
    %28 = vector.multi_reduction <maximumf>, %27, %cst_22 [1] : vector<1x24x9xf32> to vector<1x9xf32>
    %29 = vector.shape_cast %28 : vector<1x9xf32> to vector<1x1x9xf32>
    %30 = vector.broadcast %29 : vector<1x1x9xf32> to vector<1x24x9xf32>
    %31 = arith.subf %27, %30 : vector<1x24x9xf32>
    %32 = math.exp %31 : vector<1x24x9xf32>
    %cst_23 = arith.constant dense<0.000000e+00> : vector<1x9xf32>
    %33 = vector.multi_reduction <add>, %32, %cst_23 [1] : vector<1x24x9xf32> to vector<1x9xf32>
    %34 = vector.shape_cast %33 : vector<1x9xf32> to vector<1x1x9xf32>
    %35 = tpu.reciprocal %34 {approx = true} : vector<1x1x9xf32> -> vector<1x1x9xf32>
    %36 = vector.broadcast %35 : vector<1x1x9xf32> to vector<1x24x9xf32>
    %37 = arith.mulf %32, %36 : vector<1x24x9xf32>
    %38 = arith.truncf %37 : vector<1x24x9xf32> to vector<1x24x9xbf16>
    "tpu.trace_start"() <{level = 10 : i32, message = "bcq,bch->bqh"}> : () -> ()
    %cst_24 = arith.constant dense<0.000000e+00> : vector<1x9x128xf32>
    %39 = tpu.matmul %38, %0, %cst_24 {dimension_numbers = #tpu.dot_dimension_numbers<[1], [1], [2], [2], [0, 0, 0, 2, 1, 2], [0], [0]>} : vector<1x24x9xbf16>, vector<1x24x128xbf16>, vector<1x9x128xf32> -> vector<1x9x128xf32>
    %cst_25 = arith.constant -1.000000e+30 : f32
    "tpu.trace_stop"() : () -> ()
    %40 = vector.shape_cast %23 : vector<1x1x9xi1> to vector<1x1x9xi1>
    %41 = vector.broadcast %40 : vector<1x1x9xi1> to vector<1x24x9xi1>
    %42 = vector.broadcast %cst_25 : f32 to vector<1x24x9xf32>
    %43 = arith.select %41, %17, %42 : vector<1x24x9xi1>, vector<1x24x9xf32>
    %cst_26 = arith.constant dense<0xFF800000> : vector<1x24xf32>
    %44 = vector.multi_reduction <maximumf>, %43, %cst_26 [2] : vector<1x24x9xf32> to vector<1x24xf32>
    %45 = vector.shape_cast %44 : vector<1x24xf32> to vector<1x24x1xf32>
    %46 = vector.broadcast %45 : vector<1x24x1xf32> to vector<1x24x9xf32>
    %47 = arith.subf %43, %46 : vector<1x24x9xf32>
    %48 = math.exp %47 : vector<1x24x9xf32>
    %cst_27 = arith.constant dense<0.000000e+00> : vector<1x24xf32>
    %49 = vector.multi_reduction <add>, %48, %cst_27 [2] : vector<1x24x9xf32> to vector<1x24xf32>
    %50 = vector.shape_cast %49 : vector<1x24xf32> to vector<1x24x1xf32>
    %51 = tpu.reciprocal %50 {approx = true} : vector<1x24x1xf32> -> vector<1x24x1xf32>
    %52 = vector.broadcast %51 : vector<1x24x1xf32> to vector<1x24x9xf32>
    %53 = arith.mulf %48, %52 : vector<1x24x9xf32>
    %54 = arith.truncf %53 : vector<1x24x9xf32> to vector<1x24x9xbf16>
    "tpu.trace_start"() <{level = 10 : i32, message = "bcq,bqh->bch"}> : () -> ()
    %cst_28 = arith.constant dense<0.000000e+00> : vector<1x24x128xf32>
    %55 = tpu.matmul %54, %16, %cst_28 {dimension_numbers = #tpu.dot_dimension_numbers<[2], [1], [1], [2], [0, 0, 0, 1, 1, 2], [0], [0]>} : vector<1x24x9xbf16>, vector<1x9x128xbf16>, vector<1x24x128xf32> -> vector<1x24x128xf32>
    "tpu.trace_stop"() : () -> ()
    %56 = arith.truncf %39 : vector<1x9x128xf32> to vector<1x9x128xbf16>
    "tpu.trace_start"() <{level = 10 : i32, message = "bcq,bqh->bch"}> : () -> ()
    %cst_29 = arith.constant dense<0.000000e+00> : vector<1x24x128xf32>
    %57 = tpu.matmul %54, %56, %cst_29 {dimension_numbers = #tpu.dot_dimension_numbers<[2], [1], [1], [2], [0, 0, 0, 1, 1, 2], [0], [0]>} : vector<1x24x9xbf16>, vector<1x9x128xbf16>, vector<1x24x128xf32> -> vector<1x24x128xf32>
    "tpu.trace_stop"() : () -> ()
    %58 = arith.truncf %57 : vector<1x24x128xf32> to vector<1x24x128xbf16>
    %59 = arith.truncf %55 : vector<1x24x128xf32> to vector<1x24x128xbf16>
    %c0_30 = arith.constant 0 : index
    %c0_31 = arith.constant 0 : index
    %60 = vector.load %arg8[%c0_30, %c0_31] : memref<128x512xbf16, #tpu.memory_space<vmem>>, vector<128x512xbf16>
    "tpu.trace_start"() <{level = 10 : i32, message = "bch,hg->bcg"}> : () -> ()
    %cst_32 = arith.constant dense<0.000000e+00> : vector<1x24x512xf32>
    %61 = tpu.matmul %58, %60, %cst_32 {dimension_numbers = #tpu.dot_dimension_numbers<[2], [0], [0, 1], [1], [0, 0, 0, 1, 1, 1], [], []>} : vector<1x24x128xbf16>, vector<128x512xbf16>, vector<1x24x512xf32> -> vector<1x24x512xf32>
    "tpu.trace_stop"() : () -> ()
    %c0_33 = arith.constant 0 : index
    %c0_34 = arith.constant 0 : index
    %62 = vector.load %arg9[%c0_33, %c0_34] : memref<128x512xbf16, #tpu.memory_space<vmem>>, vector<128x512xbf16>
    "tpu.trace_start"() <{level = 10 : i32, message = "bch,hg->bcg"}> : () -> ()
    %cst_35 = arith.constant dense<0.000000e+00> : vector<1x24x512xf32>
    %63 = tpu.matmul %59, %62, %cst_35 {dimension_numbers = #tpu.dot_dimension_numbers<[2], [0], [0, 1], [1], [0, 0, 0, 1, 1, 1], [], []>} : vector<1x24x128xbf16>, vector<128x512xbf16>, vector<1x24x512xf32> -> vector<1x24x512xf32>
    "tpu.trace_stop"() : () -> ()
    %64 = arith.addf %61, %63 : vector<1x24x512xf32>
    %c0_36 = arith.constant 0 : index
    %c0_37 = arith.constant 0 : index
    %65 = vector.load %arg10[%c0_36, %c0_37] : memref<1x512xf32, #tpu.memory_space<vmem>>, vector<1x512xf32>
    %66 = vector.shape_cast %65 : vector<1x512xf32> to vector<1x1x512xf32>
    %67 = vector.broadcast %66 : vector<1x1x512xf32> to vector<1x24x512xf32>
    %68 = arith.addf %64, %67 : vector<1x24x512xf32>
    %69 = arith.truncf %68 : vector<1x24x512xf32> to vector<1x24x512xbf16>
    %c0_38 = arith.constant 0 : index
    %c0_39 = arith.constant 0 : index
    %c0_40 = arith.constant 0 : index
    %70 = vector.load %arg14[%c0_38, %c0_39, %c0_40] : memref<1x24x512xbf16, #tpu.memory_space<vmem>>, vector<1x24x512xbf16>
    tpu.vector_store %arg14[%c0_38, %c0_39, %c0_40], %69 {strides = array<i32>} : memref<1x24x512xbf16, #tpu.memory_space<vmem>>, vector<1x24x512xbf16>,
    %c0_41 = arith.constant 0 : index
    %c0_42 = arith.constant 0 : index
    %71 = vector.load %arg11[%c0_41, %c0_42] : memref<128x512xbf16, #tpu.memory_space<vmem>>, vector<128x512xbf16>
    "tpu.trace_start"() <{level = 10 : i32, message = "bch,hg->bcg"}> : () -> ()
    %cst_43 = arith.constant dense<0.000000e+00> : vector<1x24x512xf32>
    %72 = tpu.matmul %58, %71, %cst_43 {dimension_numbers = #tpu.dot_dimension_numbers<[2], [0], [0, 1], [1], [0, 0, 0, 1, 1, 1], [], []>} : vector<1x24x128xbf16>, vector<128x512xbf16>, vector<1x24x512xf32> -> vector<1x24x512xf32>
    "tpu.trace_stop"() : () -> ()
    %c0_44 = arith.constant 0 : index
    %c0_45 = arith.constant 0 : index
    %73 = vector.load %arg12[%c0_44, %c0_45] : memref<128x512xbf16, #tpu.memory_space<vmem>>, vector<128x512xbf16>
    "tpu.trace_start"() <{level = 10 : i32, message = "bch,hg->bcg"}> : () -> ()
    %cst_46 = arith.constant dense<0.000000e+00> : vector<1x24x512xf32>
    %74 = tpu.matmul %59, %73, %cst_46 {dimension_numbers = #tpu.dot_dimension_numbers<[2], [0], [0, 1], [1], [0, 0, 0, 1, 1, 1], [], []>} : vector<1x24x128xbf16>, vector<128x512xbf16>, vector<1x24x512xf32> -> vector<1x24x512xf32>
    "tpu.trace_stop"() : () -> ()
    %75 = arith.addf %72, %74 : vector<1x24x512xf32>
    %c0_47 = arith.constant 0 : index
    %c0_48 = arith.constant 0 : index
    %76 = vector.load %arg13[%c0_47, %c0_48] : memref<1x512xf32, #tpu.memory_space<vmem>>, vector<1x512xf32>
    %77 = vector.shape_cast %76 : vector<1x512xf32> to vector<1x1x512xf32>
    %78 = vector.broadcast %77 : vector<1x1x512xf32> to vector<1x24x512xf32>
    %79 = arith.addf %75, %78 : vector<1x24x512xf32>
    %80 = arith.truncf %79 : vector<1x24x512xf32> to vector<1x24x512xbf16>
    %c0_49 = arith.constant 0 : index
    %c0_50 = arith.constant 0 : index
    %c0_51 = arith.constant 0 : index
    %81 = vector.load %arg15[%c0_49, %c0_50, %c0_51] : memref<1x24x512xbf16, #tpu.memory_space<vmem>>, vector<1x24x512xbf16>
    tpu.vector_store %arg15[%c0_49, %c0_50, %c0_51], %80 {strides = array<i32>} : memref<1x24x512xbf16, #tpu.memory_space<vmem>>, vector<1x24x512xbf16>,
    return
  }
  func.func @transform_0(%arg0: i32) -> (i32, i32, i32) {
    %c0_i32 = arith.constant 0 : i32
    %c0_i32_0 = arith.constant 0 : i32
    %c0_i32_1 = arith.constant 0 : i32
    return %arg0, %c0_i32, %c0_i32_0 : i32, i32, i32
  }
  func.func @transform_1(%arg0: i32) -> (i32, i32, i32) {
    %c0_i32 = arith.constant 0 : i32
    %c0_i32_0 = arith.constant 0 : i32
    %c0_i32_1 = arith.constant 0 : i32
    return %arg0, %c0_i32, %c0_i32_0 : i32, i32, i32
  }
  func.func @transform_2(%arg0: i32) -> (i32, i32, i32) {
    %c0_i32 = arith.constant 0 : i32
    %c0_i32_0 = arith.constant 0 : i32
    %c0_i32_1 = arith.constant 0 : i32
    %c0_i32_2 = arith.constant 0 : i32
    return %c0_i32, %c0_i32_0, %c0_i32_1 : i32, i32, i32
  }
  func.func @transform_3(%arg0: i32) -> (i32, i32, i32) {
    %c0_i32 = arith.constant 0 : i32
    %c0_i32_0 = arith.constant 0 : i32
    %c0_i32_1 = arith.constant 0 : i32
    return %arg0, %c0_i32, %c0_i32_0 : i32, i32, i32
  }
  func.func @transform_4(%arg0: i32) -> (i32, i32, i32) {
    %c0_i32 = arith.constant 0 : i32
    %c0_i32_0 = arith.constant 0 : i32
    %c0_i32_1 = arith.constant 0 : i32
    return %arg0, %c0_i32, %c0_i32_0 : i32, i32, i32
  }
  func.func @transform_5(%arg0: i32) -> (i32, i32) {
    %c0_i32 = arith.constant 0 : i32
    %c0_i32_0 = arith.constant 0 : i32
    %c0_i32_1 = arith.constant 0 : i32
    return %c0_i32, %c0_i32_0 : i32, i32
  }
  func.func @transform_6(%arg0: i32) -> (i32, i32) {
    %c0_i32 = arith.constant 0 : i32
    %c0_i32_0 = arith.constant 0 : i32
    %c0_i32_1 = arith.constant 0 : i32
    return %c0_i32, %c0_i32_0 : i32, i32
  }
  func.func @transform_7(%arg0: i32) -> (i32, i32) {
    %c0_i32 = arith.constant 0 : i32
    %c0_i32_0 = arith.constant 0 : i32
    %c0_i32_1 = arith.constant 0 : i32
    return %c0_i32, %c0_i32_0 : i32, i32
  }
  func.func @transform_8(%arg0: i32) -> (i32, i32) {
    %c0_i32 = arith.constant 0 : i32
    %c0_i32_0 = arith.constant 0 : i32
    %c0_i32_1 = arith.constant 0 : i32
    return %c0_i32, %c0_i32_0 : i32, i32
  }
  func.func @transform_9(%arg0: i32) -> (i32, i32) {
    %c0_i32 = arith.constant 0 : i32
    %c0_i32_0 = arith.constant 0 : i32
    %c0_i32_1 = arith.constant 0 : i32
    return %c0_i32, %c0_i32_0 : i32, i32
  }
  func.func @transform_10(%arg0: i32) -> (i32, i32) {
    %c0_i32 = arith.constant 0 : i32
    %c0_i32_0 = arith.constant 0 : i32
    %c0_i32_1 = arith.constant 0 : i32
    return %c0_i32, %c0_i32_0 : i32, i32
  }
  func.func @transform_11(%arg0: i32) -> (i32, i32) {
    %c0_i32 = arith.constant 0 : i32
    %c0_i32_0 = arith.constant 0 : i32
    %c0_i32_1 = arith.constant 0 : i32
    return %c0_i32, %c0_i32_0 : i32, i32
  }
  func.func @transform_12(%arg0: i32) -> (i32, i32) {
    %c0_i32 = arith.constant 0 : i32
    %c0_i32_0 = arith.constant 0 : i32
    %c0_i32_1 = arith.constant 0 : i32
    return %c0_i32, %c0_i32_0 : i32, i32
  }
  func.func @transform_13(%arg0: i32) -> (i32, i32, i32) {
    %c0_i32 = arith.constant 0 : i32
    %c0_i32_0 = arith.constant 0 : i32
    %c0_i32_1 = arith.constant 0 : i32
    return %arg0, %c0_i32, %c0_i32_0 : i32, i32, i32
  }
  func.func @transform_14(%arg0: i32) -> (i32, i32, i32) {
    %c0_i32 = arith.constant 0 : i32
    %c0_i32_0 = arith.constant 0 : i32
    %c0_i32_1 = arith.constant 0 : i32
    return %arg0, %c0_i32, %c0_i32_0 : i32, i32, i32
  }
}

</mosaic_0001>

<bundles_post_ra>
// kernel: tpu_custom_call.1
= control target key start
LH: loop header
LB: loop body
LE: loop exit
PB: predicated region body
PF: predicated region fallthrough
CT: control target
= control target key end

     0   :  { %s4191_s0 = inlined_call_operand.vmem [shape: bf16[2,24,128], index: 0, kind: input, shape index: {}]   ;;  %s4192_s1 = inlined_call_operand.vmem [shape: bf16[2,9,128], index: 1, kind: input, shape index: {}]   ;;  %s4193_s2 = inlined_call_operand.vmem [shape: f32[1,1,128], index: 2, kind: input, shape index: {}]   ;;  %s4194_s3 = inlined_call_operand.vmem [shape: f32[2,24,1], index: 3, kind: input, shape index: {}]   ;;  %s4195_s4 = inlined_call_operand.hbm [shape: f32[2,1,9], index: 4, kind: input, shape index: {}]   ;;  %s4196_s5 = inlined_call_operand.vmem [shape: bf16[128,128], index: 5, kind: input, shape index: {}]   ;;  %s4197_s6 = inlined_call_operand.hbm [shape: f32[1,128], index: 6, kind: input, shape index: {}]   ;;  %s4198_s7 = inlined_call_operand.hbm [shape: bf16[128,512], index: 7, kind: input, shape index: {}]   ;;  %s4199_s8 = inlined_call_operand.hbm [shape: bf16[128,512], index: 8, kind: input, shape index: {}]   ;;  %s4200_s9 = inlined_call_operand.vmem [shape: f32[1,512], index: 9, kind: input, shape index: {}]   ;;  %s4201_s10 = inlined_call_operand.hbm [shape: bf16[128,512], index: 10, kind: input, shape index: {}]   ;;  %s4202_s11 = inlined_call_operand.hbm [shape: bf16[128,512], index: 11, kind: input, shape index: {}]   ;;  %s4203_s12 = inlined_call_operand.vmem [shape: f32[1,512], index: 12, kind: input, shape index: {}]   ;;  %s4204_s13 = inlined_call_operand.hbm [shape: bf16[2,24,512], index: 13, kind: output, shape index: {0}]   ;;  %s4205_s14 = inlined_call_operand.hbm [shape: bf16[2,24,512], index: 14, kind: output, shape index: {1}]  }
   0x1   :  { %4214 = sst [smem:[#allocation22_spill]] %s4193_s2 }
   0x2   :  { %4215 = sst [smem:[#allocation23_spill]] %s4197_s6 }
   0x3   :  { %4216 = sst [smem:[#allocation24_spill]] %s4199_s8 }
   0x4   :  { %4217 = sst [smem:[#allocation25_spill]] %s4200_s9 }
   0x5   :  { %4218 = sst [smem:[#allocation26_spill]] %s4203_s12 }
   0x6   :  { %4219 = sst [smem:[#allocation27_spill]] %s4204_s13 }
   0x7   :  { %4220 = sst [smem:[#allocation28_spill]] %s4205_s14 }
   0x8   :  { %20 = vsyncpa [#allocation3], 0 }
   0x9   :  { %22 = vsyncpa [#allocation3 + $0x1], 0 }
   0xa   :  { %23 = vsyncpa [#allocation6], 0 }
   0xb   :  { %24 = vsyncpa [#allocation9], 0 }
   0xc   :  { %25 = vsyncpa [#allocation12], 0 }
   0xd   :  { %26 = vsyncpa [#allocation4], 0 }
   0xe   :  { %28 = vsyncpa [#allocation4 + $0x1], 0 }
   0xf   :  { %29 = vsyncpa [#allocation15], 0 }
  0x10   :  { %31 = vsyncpa [#allocation15 + $0x1], 0  ;;  %s3661_s29 = smov 0   ;;  %s3663_s30 = smov 0  }
  0x11   :  { %s3665_s15 = smov 0   ;;  %s3667_s16 = smov 0  }
  0x12 LB: > { %s3570_s17 = smov [#allocation5]   ;;  %s3682_s19 = sadd.s32 4294967295, %s3568_s16   ;;  %s3568_s16 = sphi %s3667_s16, %s4254_s16   ;;  %s3564_s15 = sphi %s3665_s15, %s4253_s15   ;;  %s3560_s30 = sphi %s3663_s30, %s4252_s30   ;;  %s3556_s29 = sphi %s3661_s29, %s4251_s29  }
  0x13   : > { %s406_s18 = sshll.u32 %s3570_s17, 4  ;;  %p2668_p0 = scmp.ge.s32.totalorder %s3568_s16, 1  ;;  %s3687_s18 = int_to_ptr.vmem [resolvable:$true] %s406_s18 }
  0x14   : > { %p4208_p1 = scmp.eq.s32.totalorder %s3682_s19, 0  ;;  %p387_p2 = scmp.lt.s32.totalorder %s3568_s16, 3 }
  0x15   : > { %s3571_s21 = smov [#allocation8]   ;;  %s3572_s24 = smov [#allocation7]  }
  0x16   : > { %p3689_p3 = pnand %p2668_p0, %p387_p2  ;;  %s429_s22 = sshll.u32 %s3571_s21, 4  ;;  %s3702_s22 = int_to_ptr.vmem [resolvable:$true] %s429_s22 }
  0x17   : > { %s416_s25 = sshll.u32 %s3572_s24, 4  ;;  %s4223_s6 = sld [smem:[#allocation23_spill]]  ;;  %s3704_s25 = int_to_ptr.vmem [resolvable:$true] %s416_s25 }
  0x18   : > { %s4221_s20 = scalar_select %p3689_p3, 1, 0 }
  0x19   : > { %p2975_p5 = pneg %p3689_p3 }
  0x1b   : > { %p3698_p6 = pnand %p2975_p5, %p4208_p1 }
  0x1d   : > { %s3288_s28 = scalar_lea.hbm %s4223_s6, 16  ;;  %p3714_p8 = pneg %p3698_p6 }
  0x1e   : > { %p3289_p7 = scmp.ne.s32.totalorder %s4223_s6, %s3288_s28  ;;  %p3295_p11 = scmp.lt.u32.totalorder %s3288_s28, %s4223_s6 }
  0x20   : > { %p3291_p9 = pnand %p3714_p8, %p3289_p7 }
  0x22   : > { %p3292_p10 = pneg %p3291_p9 }
  0x24   : > { %p3297_p12 = pnand %p3295_p11, %p3292_p10 }
  0x26   : > { %3300 = shalt.err (!%p3297_p12)
}
  0x27   : > { %s3301_s14 = scalar_lea.vmem %s3687_s18, 16  ;;  %s3308_s26 = scalar_lea.vmem %s3687_s18, 32 }
  0x28   : > { %p3302_p13 = scmp.ne.s32.totalorder %s3687_s18, %s3301_s14  ;;  %p3309_p5 = scmp.lt.s32.totalorder %s3687_s18, %s3687_s18 }
  0x29   : > { %p3310_p7 = scmp.lt.s32.totalorder %s3308_s26, %s3301_s14 }
  0x2a   : > { %p3304_p0 = pnand %p3302_p13, %p3714_p8 }
  0x2b   : > { %p3311_p9 = por %p3310_p7, %p3309_p5 }
  0x2c   : > { %p3305_p2 = pneg %p3304_p0 }
  0x2e   : > { %p3312_p4 = pnand %p3311_p9, %p3305_p2 }
  0x30   : > { %3315 = shalt.err (!%p3312_p4)
}
  0x31   : > { %2978 = dma.hbm_to_vmem [thread:$0]  (!%p3698_p6), %s4223_s6, 16, %s3687_s18, [#allocation6]  }
  0x32   : > { %s4225_s8 = sld [smem:[#allocation24_spill]] }
  0x38   : > { %s3316_s24 = scalar_lea.hbm %s4225_s8, 4096 }
  0x39   : > { %p3317_p10 = scmp.ne.s32.totalorder %s4225_s8, %s3316_s24  ;;  %p3323_p4 = scmp.lt.u32.totalorder %s3316_s24, %s4225_s8 }
  0x3b   : > { %p3319_p11 = pnand %p3317_p10, %p3714_p8 }
  0x3d   : > { %p3320_p12 = pneg %p3319_p11 }
  0x3f   : > { %p3325_p13 = pnand %p3323_p4, %p3320_p12 }
  0x41   : > { %3328 = shalt.err (!%p3325_p13)
}
  0x42   : > { %s3329_s18 = scalar_lea.vmem %s3702_s22, 4096  ;;  %p3337_p7 = scmp.lt.s32.totalorder %s3702_s22, %s3702_s22 }
  0x43   : > { %p3330_p0 = scmp.ne.s32.totalorder %s3702_s22, %s3329_s18  ;;  %p3338_p9 = scmp.lt.s32.totalorder %s3329_s18, %s3329_s18 }
  0x45   : > { %p3332_p2 = pnand %p3330_p0, %p3714_p8  ;;  %p3339_p10 = por %p3338_p9, %p3337_p7 }
  0x47   : > { %p3333_p5 = pneg %p3332_p2 }
  0x49   : > { %p3340_p11 = pnand %p3339_p10, %p3333_p5 }
  0x4b   : > { %3343 = shalt.err (!%p3340_p11)
}
  0x4c   : > { %s3573_s9 = smov 256   ;;  %s3574_s13 = smov 16  }
  0x4d   : > { %2984 = dma.hbm_to_vmem [thread:$0]  (!%p3698_p6), %s4225_s8, 4096, %s3702_s22, [#allocation9], %s3573_s9, %s3573_s9, %s3574_s13  }
  0x4e   : > { %s3344_s24 = scalar_lea.hbm %s4198_s7, 4096 }
  0x4f   : > { %p3345_p12 = scmp.ne.s32.totalorder %s4198_s7, %s3344_s24  ;;  %p3351_p0 = scmp.lt.u32.totalorder %s3344_s24, %s4198_s7 }
  0x51   : > { %p3347_p4 = pnand %p3345_p12, %p3714_p8 }
  0x53   : > { %p3348_p13 = pneg %p3347_p4 }
  0x55   : > { %p3353_p2 = pnand %p3351_p0, %p3348_p13 }
  0x57   : > { %3356 = shalt.err (!%p3353_p2)
}
  0x58   : > { %s3357_s22 = scalar_lea.vmem %s3704_s25, 4096  ;;  %p3365_p10 = scmp.lt.s32.totalorder %s3704_s25, %s3704_s25 }
  0x59   : > { %p3358_p5 = scmp.ne.s32.totalorder %s3704_s25, %s3357_s22  ;;  %p3366_p11 = scmp.lt.s32.totalorder %s3357_s22, %s3357_s22 }
  0x5b   : > { %p3360_p7 = pnand %p3358_p5, %p3714_p8  ;;  %p3367_p12 = por %p3366_p11, %p3365_p10 }
  0x5d   : > { %p3361_p9 = pneg %p3360_p7 }
  0x5f   : > { %p3368_p4 = pnand %p3367_p12, %p3361_p9 }
  0x61   : > { %3371 = shalt.err (!%p3368_p4)
}
  0x62   : > { %2981 = dma.hbm_to_vmem [thread:$0]  (!%p3698_p6), %s4198_s7, 4096, %s3704_s25, [#allocation6], %s3573_s9, %s3573_s9, %s3574_s13  }
  0x63   : > { %s3575_s27 = smov [#allocation10]   ;;  %s3576_s17 = smov [#allocation11]  }
  0x64   : > { %s445_s28 = sshll.u32 %s3575_s27, 4  ;;  %s458_s24 = sshll.u32 %s3576_s17, 4  ;;  %s446_s28 = int_to_ptr.vmem [resolvable:$true] %s445_s28  ;;  %s459_s24 = int_to_ptr.vmem [resolvable:$true] %s458_s24 }
  0x65   : > { %s3372_s18 = scalar_lea.hbm %s4201_s10, 4096 }
  0x66   : > { %p3373_p13 = scmp.ne.s32.totalorder %s4201_s10, %s3372_s18  ;;  %p3379_p5 = scmp.lt.u32.totalorder %s3372_s18, %s4201_s10 }
  0x68   : > { %p3375_p0 = pnand %p3373_p13, %p3714_p8 }
  0x6a   : > { %p3376_p2 = pneg %p3375_p0 }
  0x6c   : > { %p3381_p7 = pnand %p3379_p5, %p3376_p2 }
  0x6e   : > { %3384 = shalt.err (!%p3381_p7)
}
  0x6f   : > { %s3385_s25 = scalar_lea.vmem %s446_s28, 4096  ;;  %p3393_p12 = scmp.lt.s32.totalorder %s446_s28, %s446_s28 }
  0x70   : > { %p3386_p9 = scmp.ne.s32.totalorder %s446_s28, %s3385_s25  ;;  %p3394_p4 = scmp.lt.s32.totalorder %s3385_s25, %s3385_s25 }
  0x72   : > { %p3388_p10 = pnand %p3386_p9, %p3714_p8  ;;  %p3395_p1 = por %p3394_p4, %p3393_p12 }
  0x74   : > { %p3389_p11 = pneg %p3388_p10 }
  0x76   : > { %p3396_p3 = pnand %p3395_p1, %p3389_p11 }
  0x78   : > { %3399 = shalt.err (!%p3396_p3)
}
  0x79   : > { %2987 = dma.hbm_to_vmem [thread:$0]  (!%p3698_p6), %s4201_s10, 4096, %s446_s28, [#allocation9], %s3573_s9, %s3573_s9, %s3574_s13  }
  0x7a   : > { %s3400_s17 = scalar_lea.hbm %s4202_s11, 4096 }
  0x7b   : > { %p3401_p1 = scmp.ne.s32.totalorder %s4202_s11, %s3400_s17  ;;  %p3407_p0 = scmp.lt.u32.totalorder %s3400_s17, %s4202_s11 }
  0x7d   : > { %p3403_p3 = pnand %p3401_p1, %p3714_p8 }
  0x7f   : > { %p3404_p13 = pneg %p3403_p3 }
  0x81   : > { %p3409_p2 = pnand %p3407_p0, %p3404_p13 }
  0x83   : > { %3412 = shalt.err (!%p3409_p2)
}
  0x84   : > { %s3413_s6 = scalar_lea.vmem %s459_s24, 4096  ;;  %p3421_p10 = scmp.lt.s32.totalorder %s459_s24, %s459_s24 }
  0x85   : > { %p3414_p5 = scmp.ne.s32.totalorder %s459_s24, %s3413_s6  ;;  %p3422_p11 = scmp.lt.s32.totalorder %s3413_s6, %s3413_s6 }
  0x87   : > { %p3416_p7 = pnand %p3414_p5, %p3714_p8  ;;  %p3423_p12 = por %p3422_p11, %p3421_p10 }
  0x89   : > { %p3417_p9 = pneg %p3416_p7 }
  0x8b   : > { %p3424_p4 = pnand %p3423_p12, %p3417_p9 }
  0x8d   : > { %3427 = shalt.err (!%p3424_p4)
}
  0x8e   : > { %2990 = dma.hbm_to_vmem [thread:$0]  (!%p3698_p6), %s4202_s11, 4096, %s459_s24, [#allocation12], %s3573_s9, %s3573_s9, %s3574_s13  }
  0x8f   : > { %s2667_s23 = sadd.s32 4294967294, %s3568_s16   ;;  %s3832_s21 = sadd.s32 1, %s3568_s16  }
  0x90   : > { %s143_s2 = sadd.s32 1, %s3564_s15  ;;  %s140_s8 = ssub.s32 %s3568_s16, %s3832_s21 }
  0x91   : > { %p150_p8 = scmp.ne.s32.totalorder %s3564_s15, %s3560_s30  ;;  %p141_p1 = scmp.eq.s32.totalorder %s140_s8, 0 }
  0x92   : > { %p151_p3 = scmp.eq.s32.totalorder %s3568_s16, 0  ;;  %p156_p13 = scmp.ne.s32.totalorder %s3560_s30, %s3556_s29 }
  0x93   : > { %p348_p0 = scmp.eq.s32.totalorder %s3682_s19, 1  ;;  %p4226_p5 = scmp.eq.s32.totalorder %s3682_s19, 0 }
  0x94   : > { %s3844_s12 = scalar_select %p141_p1, %s3564_s15, %s143_s2  }
  0x95   : > { %p152_p2 = por %p151_p3, %p150_p8  ;;  %p3848_p7 = por %p4226_p5, %p156_p13 }
  0x96   : > { %p3852_p6 = por %p348_p0, %p150_p8  ;;  %p354_p9 = scmp.eq.s32.totalorder %s2667_s23, 1 }
  0x97   : > { %p3007_p10 = scmp.lt.s32.totalorder %s3568_s16, 2  ;;  %s499_s13 = sand.u32 1, %s3564_s15  }
  0x98   : > { %s4228_s9 = scalar_select %p3852_p6, 1, 0 }
  0x99   : > { %p3858_p11 = por %p354_p9, %p156_p13  ;;  %s2675_s17 = sshll.u32 %s3568_s16, 4 }
  0x9a   : > { %s3866_s18 = scalar_lea.hbm %s4195_s4, %s2675_s17  ;;  %s502_s22 = scalar_lea.vmem [#allocation2], %s499_s13 }
  0x9b   : > { %s4229_s24 = scalar_select %p3858_p11, 1, 0 }
  0x9c   : > { %s509_s6 = sshll.u32 %s502_s22, 4  ;;  %p3870_p12 = pnand %p3007_p10, %p152_p2  ;;  %s3868_s6 = int_to_ptr.vmem [resolvable:$true] %s509_s6 }
  0x9d   : > { %s500_s25 = scalar_lea.sflag [#allocation3], %s499_s13  ;;  %s3428_s23 = scalar_lea.hbm %s3866_s18, 16 }
  0x9e   : > { %p3429_p4 = scmp.ne.s32.totalorder %s3866_s18, %s3428_s23  ;;  %p3430_p8 = pneg %p3870_p12 }
  0x9f   : > { %s3433_s17 = scalar_lea.hbm %s4195_s4, 32  ;;  %p3434_p13 = scmp.lt.u32.totalorder %s3866_s18, %s4195_s4 }
  0xa0   : > { %p3431_p1 = pnand %p3430_p8, %p3429_p4  ;;  %p3435_p0 = scmp.lt.u32.totalorder %s3433_s17, %s3428_s23 }
  0xa1   : > { %p3437_p5 = scmp.lt.u32.totalorder %s3428_s23, %s3866_s18 }
  0xa2   : > { %p3432_p3 = pneg %p3431_p1  ;;  %p3436_p2 = por %p3435_p0, %p3434_p13 }
  0xa4   : > { %p3438_p9 = por %p3437_p5, %p3436_p2 }
  0xa6   : > { %p3439_p10 = pnand %p3438_p9, %p3432_p3 }
  0xa8   : > { %3442 = shalt.err (!%p3439_p10)
}
  0xa9   : > { %s3443_s13 = scalar_lea.vmem %s3868_s6, 16  ;;  %s3577_s22 = smov [#allocation2]  }
  0xaa   : > { %p3444_p4 = scmp.ne.s32.totalorder %s3868_s6, %s3443_s13  ;;  %s3448_s2 = sshll.u32 %s3577_s22, 4  ;;  %s3449_s2 = int_to_ptr.vmem [resolvable:$false] %s3448_s2 }
  0xab   : > { %s3450_s8 = scalar_lea.vmem %s3449_s2, 32  ;;  %p3451_p6 = scmp.lt.s32.totalorder %s3868_s6, %s3449_s2 }
  0xac   : > { %p3446_p1 = pnand %p3444_p4, %p3430_p8  ;;  %p3452_p13 = scmp.lt.s32.totalorder %s3450_s8, %s3443_s13 }
  0xae   : > { %p3447_p11 = pneg %p3446_p1  ;;  %p3453_p0 = por %p3452_p13, %p3451_p6 }
  0xb0   : > { %p3454_p2 = pnand %p3453_p0, %p3447_p11 }
  0xb2   : > { %3457 = shalt.err (!%p3454_p2)
}
  0xb3   : > { %2994 = dma.hbm_to_vmem [thread:$0]  (!%p3870_p12), %s3866_s18, 16, %s3868_s6, %s500_s25  }
  0xb4   : > { %p4231_p3 = scmp.ne.s32.totalorder %s4221_s20, 0 }
  0xb5   : > { %s3902_s23 = sand.u32 (!%p4231_p3), 1, %s3560_s30  }
  0xb6   : > { %518 = sbr.rel (%p4231_p3) target bundleno = 1599 (0x63f), region = 72  ;;  %s521_s17 = scalar_lea.sflag (!%p4231_p3), [#allocation3], %s3902_s23 }
  0xb7   : > { %s523_s14 = scalar_lea.vmem (!%p4231_p3), [#allocation2], %s3902_s23 }
  0xbd   : > { %3531 = dma.done.wait (%p3848_p7), %s521_s17, 16  }
  0xbe   : > { %3533 = vsyncadd (%p3848_p7), %s521_s17, 4294967280  ;;  %p4232_p6 = scmp.eq.s32.totalorder %s3682_s19, 0 }
  0xc0   : > { %3535 = dma.done.wait (%p4232_p6), [#allocation6], 4112   ;;  %p4233_p11 = pmov %p4232_p6 }
  0xc1   : > { %p4234_p12 = pmov %p4232_p6 }
  0xc2   : > { %3537 = vsyncadd (%p4233_p11), [#allocation6], 4294963184 }
  0xc3   : > { %3539 = dma.done.wait (%p4234_p12), [#allocation9], 8192   ;;  %p4235_p8 = pmov %p4232_p6 }
  0xc4   : > { %p4236_p5 = pmov %p4232_p6 }
  0xc5   : > { %3541 = vsyncadd (%p4235_p8), [#allocation9], 4294959104 }
  0xc6   : > { %3543 = dma.done.wait (%p4236_p5), [#allocation12], 4096   ;;  %p4237_p9 = pmov %p4236_p5 }
  0xc7   : > { %v3578_v0 = vmov 0.0   ;;  %vm3579_vm0 = vmmov 0   ;;  %p607_p7 = scmp.lt.s32.totalorder %s3682_s19, 1  ;;  %v3061_v1 = vld [vmem:[%s4196_s5] sm:$0xff]   ;;  %v3062_v2 = vld [vmem:[%s4196_s5 + $0x8] sm:$0xff]   ;;  %v3063_v3 = vld [vmem:[%s4196_s5 + $0x10] sm:$0xff]   ;;  %v748_v21 = vlaneseq }
  0xc8   : > { %3545 = vsyncadd (%p4237_p9), [#allocation12], 4294963200  ;;  %2882 = vmatprep.subr.bf16.mxu0 %v3578_v0  ;;  %2898 = vmatprep.mubr.msk.bf16.mxu0 %vm3579_vm0, %v3578_v0  ;;  %v3064_v4 = vld [vmem:[%s4196_s5 + $0x18] sm:$0xff]   ;;  %v3065_v5 = vld [vmem:[%s4196_s5 + $0x20] sm:$0xff]   ;;  %v3580_v11 = vmov 0   ;;  %s4238_s22 = sld [smem:[#allocation22_spill]] }
  0xc9   : > { %s3930_s18 = scalar_select %p607_p7, %s3682_s19, 1  ;;  %2883 = vmatpush3.bf16.msra.mxu0 %v3061_v1  ;;  %v3066_v6 = vld [vmem:[%s4196_s5 + $0x28] sm:$0xff]   ;;  %v3067_v7 = vld [vmem:[%s4196_s5 + $0x30] sm:$0xff]   ;;  %v3068_v8 = vld [vmem:[%s4196_s5 + $0x38] sm:$0xff]   ;;  %3059 = vset.pattern.permute.xlu0 %v3580_v11  ;;  %v3981_v26 = vshrl.u32 %v748_v21, 7  ;;  %vm905_vm5 = vcmask 1043456  }
  0xca   : > { %2884 = vmatprep.subr.bf16.mxu0 %v3578_v0  ;;  %3060 = vset.pattern.permute.xlu1 %v3580_v11  ;;  %v2686_v18 = vld [vmem:[#allocation5] ss:$0 sm:$0xff]  ;;  %v3581_v34 = vmov 65535   ;;  %vm1000_vm6 = vcmask 1044480   ;;  %v827_v39 = vld [vmem:[%s523_s14] sm:$0x1] }
  0xcb   : > { %s2848_s25 = sshll.u32 %s3930_s18, 3  ;;  %s2945_s17 = smul.u32 12, %s3930_s18  ;;  %v750_v27 = vadd.s32 8, %v3981_v26  ;;  %v1001_v35 = vsel %vm905_vm5, 4294967295, %v3581_v34  ;;  %vm828_vm7 = vcmp.gt.f32.partialorder %v827_v39, 0.0  ;;  %v4001_v40 = vsub.s32 0, %v3981_v26 }
  0xcc   : > { %s616_s8 = scalar_lea.vmem %s4192_s1, %s2848_s25  ;;  %s2946_s28 = smul.u32 24, %s3930_s18  ;;  %v3989_v36 = vsel %vm1000_vm6, %v1001_v35, 0  ;;  %v950_v41 = vsel %vm828_vm7, 1, %v3580_v11  ;;  %vm847_vm9 = vcmask 72704   ;;  %vm901_vm13 = vcmask 195584  }
  0xcd   : > { %2885 = vmatpush3.bf16.msra.mxu0 %v3062_v2  ;;  %v3069_v9 = vld [vmem:[%s616_s8] sm:$0x1f]   ;;  %s3968_s6 = scalar_lea.vmem %s4191_s0, %s2945_s17  ;;  %vm752_vm4 = vcmp.eq.s32.totalorder %v750_v27, 8  ;;  %v954_v43 = vrot.slane %v950_v41, %v4001_v40  ;;  %s4241_s17 = sld [smem:[#allocation25_spill]] }
  0xce   : > { %2886 = vmatprep.subr.bf16.mxu0 %v3578_v0  ;;  %v3070_v10 = vld [vmem:[%s3968_s6] sm:$0xff]   ;;  %s621_s8 = scalar_lea.vmem %s4194_s3, %s2946_s28  ;;  %v3071_v33 = vld [vmem:[%s3968_s6 + $0x8] ss:$0 sps:$4 sm:$0xff]   ;;  %s2944_s20 = smul.u32 48, %s3902_s23 }
  0xcf   : > { %2904 = vmatprep.mubr.bf16.mxu1 %v3070_v10  ;;  %v821_v12 = vld [vmem:[%s621_s8] sm:$0xff]  ;;  %v822_v13 = vld [vmem:[%s621_s8 + $0x8] sm:$0xff]  ;;  %v823_v14 = vld [vmem:[%s621_s8 + $0x10] sm:$0xff]  ;;  %v907_v37 = vsel %vm905_vm5, %v3071_v33, 0  ;;  %vm4005_vm8 = vcmp.eq.s32.totalorder %v954_v43, 1  ;;  %s4211_s28 = smul.u32 768, %s3682_s19 }
  0xd0   : > { %vm824_vm1 = vcmp.gt.f32.partialorder %v821_v12, 0.0  ;;  %vm825_vm2 = vcmp.gt.f32.partialorder %v822_v13, 0.0  ;;  %vm826_vm3 = vcmp.gt.f32.partialorder %v823_v14, 0.0  ;;  %v2696_v28 = vld [vmem:[%s4238_s22] ss:$0 sm:$0xff]  ;;  %s599_s27 = scalar_lea.vmem [#allocation13], %s2944_s20 }
  0xd1   : > { %2887 = vmatpush3.bf16.msra.mxu0 %v3063_v3  ;;  %v829_v15 = vsel %vm824_vm1, 1, %v3580_v11  ;;  %v831_v16 = vsel %vm826_vm3, 1, %v3580_v11  ;;  %v830_v17 = vsel %vm825_vm2, 1, %v3580_v11  ;;  %s2465_s6 = sshll.u32 %s599_s27, 4  ;;  %s4242_s8 = sld [smem:[#allocation27_spill]]  ;;  %s4089_s6 = int_to_ptr.vmem [resolvable:$true] %s2465_s6 }
  0xd2   : > { %2888 = vmatprep.subr.bf16.mxu0 %v3578_v0  ;;  %833 = vperm.xlu0 %3059, %v829_v15   ;;  %s2447_s13 = scalar_lea.sflag [#allocation4], %s3902_s23  ;;  %s3458_s22 = scalar_lea.vmem %s4089_s6, 768 }
  0xd3   : > { %839 = vperm.xlu1 %3060, %v831_v16   ;;  %p3459_p10 = scmp.ne.s32.totalorder %s4089_s6, %s3458_s22  ;;  %p4243_p4 = scmp.ne.s32.totalorder %s4228_s9, 0 }
  0xd4   : > { %s3582_s14 = smov [#allocation13]  }
  0xd5   : > { %2889 = vmatpush3.bf16.msra.mxu0 %v3064_v4  ;;  %p3460_p1 = pnand %p3459_p10, %p4243_p4  ;;  %s3462_s2 = sshll.u32 %s3582_s14, 4  ;;  %s3463_s2 = int_to_ptr.vmem [resolvable:$false] %s3462_s2 }
  0xd6   : > { %2890 = vmatprep.subr.bf16.mxu0 %v3578_v0  ;;  %836 = vperm.xlu0 %3059, %v830_v17   ;;  %p3465_p0 = scmp.lt.s32.totalorder %s4089_s6, %s3463_s2 }
  0xd7   : > { %s4096_s18 = scalar_lea.hbm %s4242_s8, %s4211_s28  ;;  %p3461_p13 = pneg %p3460_p1 }
  0xd9   : > { %2891 = vmatpush3.bf16.msra.mxu0 %v3065_v5 }
  0xda   : > { %2892 = vmatprep.subr.bf16.mxu0 %v3578_v0 }
  0xdd   : > { %2893 = vmatpush3.bf16.msra.mxu0 %v3066_v6 }
  0xde   : > { %2894 = vmatprep.subr.bf16.mxu0 %v3578_v0 }
  0xe1   : > { %2895 = vmatpush3.bf16.msra.mxu0 %v3067_v7 }
  0xe2   : > { %2896 = vmatprep.subr.bf16.mxu0 %v3578_v0 }
  0xe5   : > { %2897 = vmatpush3.bf16.msra.mxu0 %v3068_v8 }
  0xe8   : > { %2899 = vmatmul.mubr.bf16.vlgmr.msra.gmra.mrb[0].mxu0 %v3069_v9 }
  0xe9   : > { %1366 = vmatprep.mubr.bf16.mxu0 %v3580_v11 }
 0x151   : > { %v834_v42 = vpop.permute.xlu0 %833 }
 0x152   : > { %v840_v44 = vpop.permute.xlu1 %839  ;;  %vm841_vm10 = vcmp.eq.s32.totalorder %v834_v42, 1 }
 0x153   : > { %vm843_vm11 = vcmp.eq.s32.totalorder %v840_v44, 1 }
 0x155   : > { %v837_v46 = vpop.permute.xlu0 %836 }
 0x156   : > { %vm842_vm12 = vcmp.eq.s32.totalorder %v837_v46, 1 }
 0x1bb   : > { %v739_v19 = vpop.f32.mrb[0].mxu0 }
 0x1bc   : > { %v2900_v20 = vpop.f32.mrb[1].mxu0  ;;  %v740_v22 = vadd.f32 %v2686_v18, %v739_v19 }
 0x1bd   : > { %v742_v23 = vpop.f32.mrb[2].mxu0 }
 0x1be   : > { %v743_v24 = vadd.f32 %v2686_v18, %v742_v23  ;;  %v2901_v25 = vpop.f32.mrb[3].mxu0 }
 0x1c0   : > { %3264 = vtanh.f32 %v743_v24 }
 0x1c1   : > { %3266 = vtanh.f32 %v740_v22 }
 0x1ca   : > { %v3265_v29 = vpop.eup %3264 }
 0x1cb   : > { %v3267_v30 = vpop.eup %3266  ;;  %v761_v31 = vsel %vm752_vm4, %v2696_v28, %v3265_v29 }
 0x1cc   : > { %v762_v32 = vpack.c.bf16 %v761_v31, %v3267_v30 }
 0x1ce   : > { %2902 = vmatprep.subr.bf16.mxu1 %v762_v32  ;;  %v3995_v38 = vand.u32 %v3989_v36, %v762_v32 }
 0x1cf   : > { %2903 = vmatpush3.bf16.xpose.msra.mxu1 %v762_v32 }
 0x1d0   : > { %2908 = vmatprep.subr.bf16.mxu1 %v3578_v0 }
 0x1d6   : > { %2905 = vmatmul.mubr.bf16.vlgmr.msra.gmra.mrb[0].mxu1 %v3071_v33 }
 0x1d7   : > { %2909 = vmatpush3.bf16.msra.mxu1 %v3070_v10  ;;  %2912 = vmatprep.mubr.msk.bf16.mxu1 %vm3579_vm0, %v3578_v0 }
 0x1d8   : > { %2910 = vmatprep.subr.bf16.mxu1 %v3578_v0 }
 0x1db   : > { %2911 = vmatpush3.bf16.msra.mxu1 %v907_v37 }
 0x1dc   : > { %2916 = vmatprep.subr.bf16.mxu1 %v3995_v38 }
 0x2a9   : > { %v2906_v47 = vpop.f32.mrb[0].mxu1 }
 0x2aa   : > { %v807_v48 = vpop.f32.mrb[1].mxu1  ;;  %v846_v54 = vsel %vm843_vm11, %v2906_v47, -1e+30  ;;  %v958_v63 = vsel %vm4005_vm8, %v2906_v47, -1e+30 }
 0x2ab   : > { %v844_v49 = vsel %vm841_vm10, %v807_v48, -1e+30  ;;  %v2907_v50 = vpop.f32.mrb[2].mxu1  ;;  %v956_v51 = vsel %vm4005_vm8, %v807_v48, -1e+30  ;;  %v850_v60 = vsel %vm847_vm9, %v846_v54, -inf }
 0x2ac   : > { %v810_v52 = vpop.f32.mrb[3].mxu1  ;;  %v959_v53 = vsel %vm847_vm9, %v956_v51, -inf  ;;  %v848_v57 = vsel %vm847_vm9, %v844_v49, -inf  ;;  %v965_v1 = vsel %vm847_vm9, %v958_v63, -inf }
 0x2ad   : > { %v845_v55 = vsel %vm842_vm12, %v810_v52, -1e+30  ;;  %960 = vmax.xlane.f32.xlu0 %v959_v53  ;;  %v957_v56 = vsel %vm4005_vm8, %v810_v52, -1e+30 }
 0x2ae   : > { %v849_v58 = vsel %vm847_vm9, %v845_v55, -inf  ;;  %v962_v61 = vsel %vm847_vm9, %v957_v56, -inf }
 0x2af   : > { %v851_v59 = vmax.f32 %v848_v57, %v849_v58  ;;  %v3078_v57 = vld [vmem:[#allocation8 + $0x20] ss:$16 sps:$4 sm:$0xff]   ;;  %v3086_v58 = vld [vmem:[#allocation8 + $0x44] ss:$16 sps:$4 sm:$0xff]  }
 0x2b1   : > { %v852_v62 = vmax.f32 %v851_v59, %v850_v60  ;;  %963 = vmax.xlane.f32.xlu0 %v962_v61  ;;  %v3084_v59 = vld [vmem:[#allocation8 + $0x40] ss:$16 sps:$4 sm:$0xff]   ;;  %v3092_v60 = vld [vmem:[#allocation8 + $0x64] ss:$16 sps:$4 sm:$0xff]  }
 0x2b2   : > { %v3090_v61 = vld [vmem:[#allocation8 + $0x60] ss:$16 sps:$4 sm:$0xff]  }
 0x2b3   : > { %v853_v0 = vrot.slane %v852_v62, 4 }
 0x2b5   : > { %v854_v2 = vmax.f32 %v852_v62, %v853_v0  ;;  %966 = vmax.xlane.f32.xlu0 %v965_v1  ;;  %v3098_v62 = vld [vmem:[#allocation8 + $0x84] ss:$16 sps:$4 sm:$0xff]   ;;  %v3102_v0 = vld [vmem:[#allocation8 + $0xa0] ss:$16 sps:$4 sm:$0xff]  }
 0x2b6   : > { %v3110_v1 = vld [vmem:[#allocation8 + $0xc4] ss:$16 sps:$4 sm:$0xff]  }
 0x2b7   : > { %v855_v3 = vrot.slane %v854_v2, 2 }
 0x2b9   : > { %v856_v4 = vmax.f32 %v854_v2, %v855_v3  ;;  %v3108_v2 = vld [vmem:[#allocation8 + $0xc0] ss:$16 sps:$4 sm:$0xff]  }
 0x2bb   : > { %v857_v5 = vrot.slane %v856_v4, 1 }
 0x2bd   : > { %v858_v6 = vmax.f32 %v856_v4, %v857_v5 }
 0x2bf   : > { %v859_v7 = vsub.f32 %v844_v49, %v858_v6  ;;  %v860_v8 = vsub.f32 %v845_v55, %v858_v6  ;;  %v861_v9 = vsub.f32 %v846_v54, %v858_v6  ;;  %v3072_v54 = vld [vmem:[#allocation8] ss:$16 sps:$4 sm:$0xff]   ;;  %v3074_v55 = vld [vmem:[#allocation8 + $0x4] ss:$16 sps:$4 sm:$0xff]  }
 0x2c0   : > { %1334 = vmatprep.subr.bf16.mxu0 %v3074_v55  ;;  %v3134_v55 = vld [vmem:[#allocation7 + $0x44] ss:$16 sps:$4 sm:$0xff]  }
 0x2c1   : > { %v862_v10 = vmul.f32 1.442695, %v859_v7  ;;  %v864_v12 = vmul.f32 1.442695, %v860_v8  ;;  %v866_v13 = vmul.f32 1.442695, %v861_v9  ;;  %1335 = vmatpush1.bf16.msra.mxu0 %v3072_v54 }
 0x2c2   : > { %v3129_v54 = vld [vmem:[#allocation7 + $0x28] ss:$16 sps:$4 sm:$0xff]  }
 0x2c3   : > { %3268 = vpow2.f32 %v862_v10 }
 0x2c4   : > { %3270 = vpow2.f32 %v864_v12 }
 0x2c5   : > { %3272 = vpow2.f32 %v866_v13 }
 0x2cd   : > { %v3269_v14 = vpop.eup %3268 }
 0x2ce   : > { %v3271_v15 = vpop.eup %3270  ;;  %v868_v16 = vsel %vm847_vm9, %v3269_v14, 0.0 }
 0x2cf   : > { %v3273_v17 = vpop.eup %3272  ;;  %v869_v18 = vsel %vm847_vm9, %v3271_v15, 0.0 }
 0x2d0   : > { %v870_v19 = vadd.f32 %v869_v18, %v868_v16  ;;  %v871_v20 = vsel %vm847_vm9, %v3273_v17, 0.0 }
 0x2d2   : > { %v872_v21 = vadd.f32 %v871_v20, %v870_v19 }
 0x2d4   : > { %v873_v22 = vrot.slane %v872_v21, 4 }
 0x2d6   : > { %v874_v23 = vadd.f32 %v873_v22, %v872_v21  ;;  %v3077_v21 = vld [vmem:[#allocation8 + $0xc] ss:$16 sps:$4 sm:$0xff]   ;;  %v3075_v22 = vld [vmem:[#allocation8 + $0x8] ss:$16 sps:$4 sm:$0xff]  }
 0x2d8   : > { %v875_v24 = vrot.slane %v874_v23, 2 }
 0x2da   : > { %v876_v25 = vadd.f32 %v875_v24, %v874_v23  ;;  %v3083_v23 = vld [vmem:[#allocation8 + $0x2c] ss:$16 sps:$4 sm:$0xff]   ;;  %v3081_v24 = vld [vmem:[#allocation8 + $0x28] ss:$16 sps:$4 sm:$0xff]  }
 0x2dc   : > { %v877_v27 = vrot.slane %v876_v25, 1 }
 0x2de   : > { %v878_v28 = vadd.f32 %v877_v27, %v876_v25  ;;  %v3089_v25 = vld [vmem:[#allocation8 + $0x4c] ss:$16 sps:$4 sm:$0xff]   ;;  %v3087_v27 = vld [vmem:[#allocation8 + $0x48] ss:$16 sps:$4 sm:$0xff]  }
 0x2e0   : > { %3274 = vrcp.f32 %v878_v28  ;;  %v3095_v28 = vld [vmem:[#allocation8 + $0x6c] ss:$16 sps:$4 sm:$0xff]  }
 0x2ea   : > { %v3275_v29 = vpop.eup %3274 }
 0x2eb   : > { %v880_v30 = vmul.f32 %v3275_v29, %v3269_v14  ;;  %v881_v31 = vmul.f32 %v3275_v29, %v3271_v15  ;;  %v882_v32 = vmul.f32 %v3275_v29, %v3273_v17  ;;  %v3101_v29 = vld [vmem:[#allocation8 + $0x8c] ss:$16 sps:$4 sm:$0xff]  }
 0x2ed   : > { %v883_v33 = vpack.c.bf16 %v881_v31, %v880_v30  ;;  %v884_v34 = vpack.c.bf16 %v882_v32, %v882_v32  ;;  %v3099_v30 = vld [vmem:[#allocation8 + $0x88] ss:$16 sps:$4 sm:$0xff]   ;;  %v3107_v31 = vld [vmem:[#allocation8 + $0xac] ss:$16 sps:$4 sm:$0xff]  }
 0x2ee   : > { %v3105_v32 = vld [vmem:[#allocation8 + $0xa8] ss:$16 sps:$4 sm:$0xff]  }
 0x2ef   : > { %885 = vxpose.xlu1.c.b16.start [1/2] (short) (narrow) %v883_v33, 16  ;;  %v3114_v33 = vld [vmem:[#allocation8 + $0xe0] ss:$16 sps:$4 sm:$0xff]  }
 0x2f3   : > { %886 = vxpose.xlu1.c.b16.end [2/2] (short) (narrow) %v884_v34, 16  ;;  %v3116_v34 = vld [vmem:[#allocation8 + $0xe4] ss:$16 sps:$4 sm:$0xff]  }
 0x33a   : > { %v961_v35 = vpop.xlane.xlu0 %960 }
 0x33b   : > { %v968_v37 = vsub.f32 %v956_v51, %v961_v35  ;;  %v3113_v35 = vld [vmem:[#allocation8 + $0xcc] ss:$16 sps:$4 sm:$0xff]  }
 0x33d   : > { %v971_v39 = vmul.f32 1.442695, %v968_v37  ;;  %v3111_v37 = vld [vmem:[#allocation8 + $0xc8] ss:$16 sps:$4 sm:$0xff]  }
 0x33e   : > { %v964_v41 = vpop.xlane.xlu0 %963 }
 0x33f   : > { %3276 = vpow2.f32 %v971_v39  ;;  %v969_v42 = vsub.f32 %v957_v56, %v964_v41  ;;  %v3080_v56 = vld [vmem:[#allocation8 + $0x24] ss:$16 sps:$4 sm:$0xff]   ;;  %v3119_v39 = vld [vmem:[#allocation8 + $0xec] ss:$16 sps:$4 sm:$0xff]   ;;  %v3117_v41 = vld [vmem:[#allocation8 + $0xe8] ss:$16 sps:$4 sm:$0xff]  }
 0x340   : > { %1336 = vmatprep.subr.bf16.mxu0 %v3080_v56  ;;  %v3137_v56 = vld [vmem:[#allocation7 + $0x4c] ss:$16 sps:$4 sm:$0xff]  }
 0x341   : > { %v973_v43 = vmul.f32 1.442695, %v969_v42  ;;  %1337 = vmatpush1.bf16.msra.mxu0 %v3078_v57  ;;  %v3122_v42 = vld [vmem:[#allocation7 + $0x4] ss:$16 sps:$4 sm:$0xff]  }
 0x342   : > { %v967_v44 = vpop.xlane.xlu0 %966  ;;  %1338 = vmatprep.subr.bf16.mxu0 %v3086_v58  ;;  %v3132_v58 = vld [vmem:[#allocation7 + $0x40] ss:$16 sps:$4 sm:$0xff]  }
 0x343   : > { %3278 = vpow2.f32 %v973_v43  ;;  %v970_v45 = vsub.f32 %v958_v63, %v967_v44  ;;  %v3096_v63 = vld [vmem:[#allocation8 + $0x80] ss:$16 sps:$4 sm:$0xff]   ;;  %v3125_v43 = vld [vmem:[#allocation7 + $0xc] ss:$16 sps:$4 sm:$0xff]  }
 0x345   : > { %v975_v46 = vmul.f32 1.442695, %v970_v45  ;;  %1339 = vmatpush1.bf16.msra.mxu0 %v3084_v59  ;;  %v3135_v59 = vld [vmem:[#allocation7 + $0x48] ss:$16 sps:$4 sm:$0xff]  }
 0x346   : > { %1340 = vmatprep.subr.bf16.mxu0 %v3092_v60  ;;  %v3140_v60 = vld [vmem:[#allocation7 + $0x64] ss:$16 sps:$4 sm:$0xff]  }
 0x347   : > { %3280 = vpow2.f32 %v975_v46 }
 0x349   : > { %v3277_v47 = vpop.eup %3276  ;;  %1341 = vmatpush1.bf16.msra.mxu0 %v3090_v61  ;;  %v3143_v61 = vld [vmem:[#allocation7 + $0x6c] ss:$16 sps:$4 sm:$0xff]  }
 0x34a   : > { %v977_v48 = vsel %vm847_vm9, %v3277_v47, 0.0  ;;  %1342 = vmatprep.subr.bf16.mxu0 %v3098_v62  ;;  %v3138_v62 = vld [vmem:[#allocation7 + $0x60] ss:$16 sps:$4 sm:$0xff]  }
 0x34b   : > { %978 = vadd.xlane.f32.xlu1 %v977_v48 }
 0x34d   : > { %v3279_v49 = vpop.eup %3278  ;;  %1343 = vmatpush1.bf16.msra.mxu0 %v3096_v63  ;;  %v3141_v63 = vld [vmem:[#allocation7 + $0x68] ss:$16 sps:$4 sm:$0xff]  }
 0x34e   : > { %v980_v50 = vsel %vm847_vm9, %v3279_v49, 0.0 }
 0x34f   : > { %981 = vadd.xlane.f32.xlu0 %v980_v50  ;;  %v3123_v50 = vld [vmem:[#allocation7 + $0x8] ss:$16 sps:$4 sm:$0xff]  }
 0x351   : > { %v3281_v52 = vpop.eup %3280 }
 0x352   : > { %v983_v51 = vsel %vm847_vm9, %v3281_v52, 0.0 }
 0x353   : > { %984 = vadd.xlane.f32.xlu0 %v983_v51  ;;  %v3131_v51 = vld [vmem:[#allocation7 + $0x2c] ss:$16 sps:$4 sm:$0xff]  }
 0x355   : > { %v893_v53 = vpop.trf.xlu1 }
 0x356   : > { %2913 = vmatmul.mubr.msk.bf16.vlgmr.msra.gmra.mrb[4].mxu1 %vm901_vm13, %v893_v53  ;;  %v3126_v53 = vld [vmem:[#allocation7 + $0x20] ss:$16 sps:$4 sm:$0xff]  }
 0x357   : > { %2917 = vmatpush3.bf16.msra.mxu1 %v3995_v38  ;;  %v3104_v38 = vld [vmem:[#allocation8 + $0xa4] ss:$16 sps:$4 sm:$0xff]  }
 0x358   : > { %1344 = vmatprep.subr.bf16.mxu0 %v3104_v38  ;;  %v3146_v38 = vld [vmem:[#allocation7 + $0x84] ss:$16 sps:$4 sm:$0xff]  }
 0x359   : > { %1345 = vmatpush1.bf16.msra.mxu0 %v3102_v0  ;;  %v3149_v0 = vld [vmem:[#allocation7 + $0x8c] ss:$16 sps:$4 sm:$0xff]  }
 0x35a   : > { %1346 = vmatprep.subr.bf16.mxu0 %v3110_v1  ;;  %v3144_v1 = vld [vmem:[#allocation7 + $0x80] ss:$16 sps:$4 sm:$0xff]  }
 0x35d   : > { %1347 = vmatpush1.bf16.msra.mxu0 %v3108_v2  ;;  %v3147_v2 = vld [vmem:[#allocation7 + $0x88] ss:$16 sps:$4 sm:$0xff]  }
 0x35e   : > { %1348 = vmatprep.subr.bf16.mxu0 %v3116_v34  ;;  %v3188_v34 = vld [vmem:[#allocation11 + $0x64] ss:$16 sps:$4 sm:$0xff]  }
 0x361   : > { %1349 = vmatpush1.bf16.msra.mxu0 %v3114_v33 }
 0x362   : > { %1596 = vmatprep.subr.bf16.mxu0 %v3122_v42  ;;  %v3197_v42 = vld [vmem:[#allocation11 + $0x8c] ss:$16 sps:$4 sm:$0xff]  }
 0x3d8   : > { %v979_v3 = vpop.xlane.xlu1 %978 }
 0x3d9   : > { %3282 = vrcp.f32 %v979_v3  ;;  %v3152_v3 = vld [vmem:[#allocation7 + $0xa4] ss:$16 sps:$4 sm:$0xff]  }
 0x3dc   : > { %v982_v4 = vpop.xlane.xlu0 %981 }
 0x3dd   : > { %3284 = vrcp.f32 %v982_v4  ;;  %v3155_v4 = vld [vmem:[#allocation7 + $0xac] ss:$16 sps:$4 sm:$0xff]  }
 0x3e0   : > { %v985_v5 = vpop.xlane.xlu0 %984 }
 0x3e1   : > { %3286 = vrcp.f32 %v985_v5  ;;  %v3150_v5 = vld [vmem:[#allocation7 + $0xa0] ss:$16 sps:$4 sm:$0xff]  }
 0x3e3   : > { %v3283_v6 = vpop.eup %3282 }
 0x3e4   : > { %v989_v8 = vmul.f32 %v3283_v6, %v3277_v47  ;;  %v3153_v6 = vld [vmem:[#allocation7 + $0xa8] ss:$16 sps:$4 sm:$0xff]  }
 0x3e7   : > { %v3285_v7 = vpop.eup %3284 }
 0x3e8   : > { %v990_v9 = vmul.f32 %v3285_v7, %v3279_v49  ;;  %v3120_v49 = vld [vmem:[#allocation7] ss:$16 sps:$4 sm:$0xff]   ;;  %v3158_v7 = vld [vmem:[#allocation7 + $0xc4] ss:$16 sps:$4 sm:$0xff]  }
 0x3ea   : > { %v992_v10 = vpack.c.bf16 %v990_v9, %v989_v8  ;;  %v3161_v8 = vld [vmem:[#allocation7 + $0xcc] ss:$16 sps:$4 sm:$0xff]   ;;  %v3156_v9 = vld [vmem:[#allocation7 + $0xc0] ss:$16 sps:$4 sm:$0xff]  }
 0x3eb   : > { %v3287_v12 = vpop.eup %3286 }
 0x3ec   : > { %v991_v13 = vmul.f32 %v3287_v12, %v3281_v52  ;;  %2918 = vmatprep.mubr.msk.bf16.mxu1 %vm847_vm9, %v992_v10  ;;  %v3128_v52 = vld [vmem:[#allocation7 + $0x24] ss:$16 sps:$4 sm:$0xff]  }
 0x3ed   : > { %v3164_v12 = vld [vmem:[#allocation7 + $0xe4] ss:$16 sps:$4 sm:$0xff]  }
 0x3ee   : > { %v993_v14 = vpack.c.bf16 %v991_v13, %v991_v13  ;;  %v3167_v13 = vld [vmem:[#allocation7 + $0xec] ss:$16 sps:$4 sm:$0xff]  }
 0x3f0   : > { %2919 = vmatmul.mubr.msk.bf16.vlgmr.msra.gmra.mrb[8].mxu1 %vm847_vm9, %v993_v14 }
 0x3f1   : > { %2924 = vmatprep.mubr.msk.bf16.mxu1 %vm847_vm9, %v992_v10  ;;  %v3159_v10 = vld [vmem:[#allocation7 + $0xc8] ss:$16 sps:$4 sm:$0xff]  }
 0x429   : > { %v943_v15 = vpop.f32.mrb[4].mxu1 }
 0x42a   : > { %v2914_v16 = vpop.f32.mrb[5].mxu1 }
 0x42b   : > { %v946_v17 = vpop.f32.mrb[6].mxu1  ;;  %v3170_v16 = vld [vmem:[#allocation11 + $0x4] ss:$16 sps:$4 sm:$0xff]  }
 0x42c   : > { %v1054_v18 = vpack.c.bf16 %v946_v17, %v943_v15  ;;  %v2915_v19 = vpop.f32.mrb[7].mxu1  ;;  %v3165_v15 = vld [vmem:[#allocation7 + $0xe8] ss:$16 sps:$4 sm:$0xff]   ;;  %v3173_v17 = vld [vmem:[#allocation11 + $0xc] ss:$16 sps:$4 sm:$0xff]  }
 0x42e   : > { %v1056_v20 = vand.u32 %v1054_v18, %v3989_v36  ;;  %v3093_v36 = vld [vmem:[#allocation8 + $0x68] ss:$16 sps:$4 sm:$0xff]  }
 0x430   : > { %2922 = vmatprep.subr.bf16.mxu1 %v1056_v20 }
 0x431   : > { %2923 = vmatpush3.bf16.msra.mxu1 %v1056_v20 }
 0x432   : > { %1385 = vmatprep.subr.bf16.mxu1 %v3077_v21 }
 0x434   : > { %2925 = vmatmul.mubr.msk.bf16.vlgmr.msra.gmra.mrb[12].mxu1 %vm847_vm9, %v993_v14  ;;  %v3162_v14 = vld [vmem:[#allocation7 + $0xe0] ss:$16 sps:$4 sm:$0xff]  }
 0x435   : > { %1386 = vmatpush1.bf16.msra.mxu1 %v3075_v22  ;;  %1417 = vmatprep.mubr.bf16.mxu1 %v3580_v11  ;;  %v3168_v22 = vld [vmem:[#allocation11] ss:$16 sps:$4 sm:$0xff]  }
 0x436   : > { %1387 = vmatprep.subr.bf16.mxu1 %v3083_v23  ;;  %v3171_v23 = vld [vmem:[#allocation11 + $0x8] ss:$16 sps:$4 sm:$0xff]  }
 0x439   : > { %1388 = vmatpush1.bf16.msra.mxu1 %v3081_v24 }
 0x43a   : > { %1389 = vmatprep.subr.bf16.mxu1 %v3089_v25  ;;  %v3176_v25 = vld [vmem:[#allocation11 + $0x24] ss:$16 sps:$4 sm:$0xff]  }
 0x43d   : > { %1390 = vmatpush1.bf16.msra.mxu1 %v3087_v27  ;;  %v3179_v27 = vld [vmem:[#allocation11 + $0x2c] ss:$16 sps:$4 sm:$0xff]  }
 0x43e   : > { %1391 = vmatprep.subr.bf16.mxu1 %v3095_v28  ;;  %v3174_v28 = vld [vmem:[#allocation11 + $0x20] ss:$16 sps:$4 sm:$0xff]  }
 0x441   : > { %1392 = vmatpush1.bf16.msra.mxu1 %v3093_v36  ;;  %v3177_v36 = vld [vmem:[#allocation11 + $0x28] ss:$16 sps:$4 sm:$0xff]  }
 0x442   : > { %1393 = vmatprep.subr.bf16.mxu1 %v3101_v29  ;;  %v3182_v29 = vld [vmem:[#allocation11 + $0x44] ss:$16 sps:$4 sm:$0xff]  }
 0x445   : > { %1394 = vmatpush1.bf16.msra.mxu1 %v3099_v30  ;;  %v3185_v30 = vld [vmem:[#allocation11 + $0x4c] ss:$16 sps:$4 sm:$0xff]  }
 0x446   : > { %1395 = vmatprep.subr.bf16.mxu1 %v3107_v31  ;;  %v3180_v31 = vld [vmem:[#allocation11 + $0x40] ss:$16 sps:$4 sm:$0xff]  }
 0x449   : > { %1396 = vmatpush1.bf16.msra.mxu1 %v3105_v32  ;;  %v3183_v32 = vld [vmem:[#allocation11 + $0x48] ss:$16 sps:$4 sm:$0xff]  }
 0x44a   : > { %1397 = vmatprep.subr.bf16.mxu1 %v3113_v35  ;;  %v3191_v35 = vld [vmem:[#allocation11 + $0x6c] ss:$16 sps:$4 sm:$0xff]  }
 0x44d   : > { %1398 = vmatpush1.bf16.msra.mxu1 %v3111_v37  ;;  %v3186_v37 = vld [vmem:[#allocation11 + $0x60] ss:$16 sps:$4 sm:$0xff]  }
 0x44e   : > { %1399 = vmatprep.subr.bf16.mxu1 %v3119_v39  ;;  %v3189_v39 = vld [vmem:[#allocation11 + $0x68] ss:$16 sps:$4 sm:$0xff]  }
 0x451   : > { %1400 = vmatpush1.bf16.msra.mxu1 %v3117_v41  ;;  %v3194_v41 = vld [vmem:[#allocation11 + $0x84] ss:$16 sps:$4 sm:$0xff]  }
 0x452   : > { %1647 = vmatprep.subr.bf16.mxu1 %v3125_v43  ;;  %v3192_v43 = vld [vmem:[#allocation11 + $0x80] ss:$16 sps:$4 sm:$0xff]  }
 0x4c3   : > { %v2920_v44 = vpop.f32.mrb[8].mxu1 }
 0x4c4   : > { %v1040_v45 = vpop.f32.mrb[9].mxu1  ;;  %v4040_v57 = vpack.c.bf16 %v2920_v44, %v2920_v44  ;;  %v3195_v44 = vld [vmem:[#allocation11 + $0x88] ss:$16 sps:$4 sm:$0xff]  }
 0x4c5   : > { %v2921_v46 = vpop.f32.mrb[10].mxu1 }
 0x4c6   : > { %v1043_v47 = vpop.f32.mrb[11].mxu1  ;;  %v3203_v46 = vld [vmem:[#allocation11 + $0xac] ss:$16 sps:$4 sm:$0xff]  }
 0x4c7   : > { %v4034_v48 = vpack.c.bf16 %v1043_v47, %v1040_v45  ;;  %v3200_v45 = vld [vmem:[#allocation11 + $0xa4] ss:$16 sps:$4 sm:$0xff]   ;;  %v3198_v47 = vld [vmem:[#allocation11 + $0xa0] ss:$16 sps:$4 sm:$0xff]  }
 0x4c9   : > { %1367 = vmatmul.mubr.bf16.vlgmr.msra.gmra.mrb[4].mxu0 %v4034_v48  ;;  %1418 = vmatmul.mubr.bf16.vlgmr.msra.gmra.mrb[16].mxu1 %v4034_v48 }
 0x4ca   : > { %1376 = vmatprep.mubr.bf16.mxu0 %v3580_v11  ;;  %1427 = vmatprep.mubr.bf16.mxu1 %v3580_v11 }
 0x4cb   : > { %1597 = vmatpush1.bf16.msra.mxu0 %v3120_v49  ;;  %1648 = vmatpush1.bf16.msra.mxu1 %v3123_v50  ;;  %v3201_v49 = vld [vmem:[#allocation11 + $0xa8] ss:$16 sps:$4 sm:$0xff]   ;;  %v3206_v50 = vld [vmem:[#allocation11 + $0xc4] ss:$16 sps:$4 sm:$0xff]  }
 0x4cc   : > { %1598 = vmatprep.subr.bf16.mxu0 %v3128_v52  ;;  %1649 = vmatprep.subr.bf16.mxu1 %v3131_v51  ;;  %v3209_v52 = vld [vmem:[#allocation11 + $0xcc] ss:$16 sps:$4 sm:$0xff]   ;;  %v3204_v51 = vld [vmem:[#allocation11 + $0xc0] ss:$16 sps:$4 sm:$0xff]  }
 0x4cf   : > { %1599 = vmatpush1.bf16.msra.mxu0 %v3126_v53  ;;  %1650 = vmatpush1.bf16.msra.mxu1 %v3129_v54  ;;  %v3207_v53 = vld [vmem:[#allocation11 + $0xc8] ss:$16 sps:$4 sm:$0xff]   ;;  %v3212_v54 = vld [vmem:[#allocation11 + $0xe4] ss:$16 sps:$4 sm:$0xff]  }
 0x4d0   : > { %1600 = vmatprep.subr.bf16.mxu0 %v3134_v55  ;;  %1651 = vmatprep.subr.bf16.mxu1 %v3137_v56  ;;  %v3215_v55 = vld [vmem:[#allocation11 + $0xec] ss:$16 sps:$4 sm:$0xff]   ;;  %v3210_v56 = vld [vmem:[#allocation11 + $0xe0] ss:$16 sps:$4 sm:$0xff]  }
 0x4d1   : > { %1377 = vmatmul.mubr.bf16.gmra.mrb[8].mxu0 %v4040_v57  ;;  %1428 = vmatmul.mubr.bf16.gmra.mrb[20].mxu1 %v4040_v57 }
 0x4d2   : > { %1628 = vmatprep.mubr.bf16.mxu0 %v3580_v11  ;;  %1679 = vmatprep.mubr.bf16.mxu1 %v3580_v11 }
 0x4d3   : > { %1601 = vmatpush1.bf16.msra.mxu0 %v3132_v58  ;;  %1652 = vmatpush1.bf16.msra.mxu1 %v3135_v59  ;;  %v3213_v58 = vld [vmem:[#allocation11 + $0xe8] ss:$16 sps:$4 sm:$0xff]   ;;  %v3218_v59 = vld [vmem:[#allocation10 + $0x4] ss:$16 sps:$4 sm:$0xff]  }
 0x4d4   : > { %1602 = vmatprep.subr.bf16.mxu0 %v3140_v60  ;;  %1653 = vmatprep.subr.bf16.mxu1 %v3143_v61  ;;  %v3221_v60 = vld [vmem:[#allocation10 + $0xc] ss:$16 sps:$4 sm:$0xff]   ;;  %v3216_v61 = vld [vmem:[#allocation10] ss:$16 sps:$4 sm:$0xff]  }
 0x4d7   : > { %1603 = vmatpush1.bf16.msra.mxu0 %v3138_v62  ;;  %1654 = vmatpush1.bf16.msra.mxu1 %v3141_v63  ;;  %v3219_v62 = vld [vmem:[#allocation10 + $0x8] ss:$16 sps:$4 sm:$0xff]   ;;  %v3224_v63 = vld [vmem:[#allocation10 + $0x24] ss:$16 sps:$4 sm:$0xff]  }
 0x4d8   : > { %1604 = vmatprep.subr.bf16.mxu0 %v3146_v38  ;;  %1655 = vmatprep.subr.bf16.mxu1 %v3149_v0  ;;  %v3227_v38 = vld [vmem:[#allocation10 + $0x2c] ss:$16 sps:$4 sm:$0xff]   ;;  %v3222_v0 = vld [vmem:[#allocation10 + $0x20] ss:$16 sps:$4 sm:$0xff]  }
 0x4db   : > { %1605 = vmatpush1.bf16.msra.mxu0 %v3144_v1  ;;  %1656 = vmatpush1.bf16.msra.mxu1 %v3147_v2  ;;  %v3225_v1 = vld [vmem:[#allocation10 + $0x28] ss:$16 sps:$4 sm:$0xff]   ;;  %v3230_v2 = vld [vmem:[#allocation10 + $0x44] ss:$16 sps:$4 sm:$0xff]  }
 0x4dc   : > { %1606 = vmatprep.subr.bf16.mxu0 %v3152_v3  ;;  %1657 = vmatprep.subr.bf16.mxu1 %v3155_v4  ;;  %v3233_v3 = vld [vmem:[#allocation10 + $0x4c] ss:$16 sps:$4 sm:$0xff]   ;;  %v3228_v4 = vld [vmem:[#allocation10 + $0x40] ss:$16 sps:$4 sm:$0xff]  }
 0x4df   : > { %1607 = vmatpush1.bf16.msra.mxu0 %v3150_v5  ;;  %1658 = vmatpush1.bf16.msra.mxu1 %v3153_v6  ;;  %v3231_v5 = vld [vmem:[#allocation10 + $0x48] ss:$16 sps:$4 sm:$0xff]   ;;  %v3236_v6 = vld [vmem:[#allocation10 + $0x64] ss:$16 sps:$4 sm:$0xff]  }
 0x4e0   : > { %1608 = vmatprep.subr.bf16.mxu0 %v3158_v7  ;;  %1659 = vmatprep.subr.bf16.mxu1 %v3161_v8  ;;  %v3234_v7 = vld [vmem:[#allocation10 + $0x60] ss:$16 sps:$4 sm:$0xff]   ;;  %v3237_v8 = vld [vmem:[#allocation10 + $0x68] ss:$16 sps:$4 sm:$0xff]  }
 0x4e3   : > { %1609 = vmatpush1.bf16.msra.mxu0 %v3156_v9  ;;  %1660 = vmatpush1.bf16.msra.mxu1 %v3159_v10  ;;  %v3242_v9 = vld [vmem:[#allocation10 + $0x84] ss:$16 sps:$4 sm:$0xff]   ;;  %v3245_v10 = vld [vmem:[#allocation10 + $0x8c] ss:$16 sps:$4 sm:$0xff]  }
 0x4e4   : > { %1610 = vmatprep.subr.bf16.mxu0 %v3164_v12  ;;  %1661 = vmatprep.subr.bf16.mxu1 %v3167_v13  ;;  %v3240_v12 = vld [vmem:[#allocation10 + $0x80] ss:$16 sps:$4 sm:$0xff]   ;;  %v3243_v13 = vld [vmem:[#allocation10 + $0x88] ss:$16 sps:$4 sm:$0xff]  }
 0x4e7   : > { %1611 = vmatpush1.bf16.msra.mxu0 %v3162_v14  ;;  %1662 = vmatpush1.bf16.msra.mxu1 %v3165_v15  ;;  %v3248_v14 = vld [vmem:[#allocation10 + $0xa4] ss:$16 sps:$4 sm:$0xff]   ;;  %v3246_v15 = vld [vmem:[#allocation10 + $0xa0] ss:$16 sps:$4 sm:$0xff]  }
 0x4e8   : > { %2002 = vmatprep.subr.bf16.mxu0 %v3170_v16  ;;  %2053 = vmatprep.subr.bf16.mxu1 %v3173_v17  ;;  %v3249_v16 = vld [vmem:[#allocation10 + $0xa8] ss:$16 sps:$4 sm:$0xff]   ;;  %v3254_v17 = vld [vmem:[#allocation10 + $0xc4] ss:$16 sps:$4 sm:$0xff]  }
 0x507   : > { %v2926_v18 = vpop.f32.mrb[12].mxu1 }
 0x508   : > { %v1092_v19 = vpop.f32.mrb[13].mxu1  ;;  %v4052_v33 = vpack.c.bf16 %v2926_v18, %v2926_v18  ;;  %v3257_v18 = vld [vmem:[#allocation10 + $0xcc] ss:$16 sps:$4 sm:$0xff]  }
 0x509   : > { %v2927_v20 = vpop.f32.mrb[14].mxu1 }
 0x50a   : > { %v1095_v21 = vpop.f32.mrb[15].mxu1  ;;  %v3255_v20 = vld [vmem:[#allocation10 + $0xc8] ss:$16 sps:$4 sm:$0xff]  }
 0x50b   : > { %v4046_v24 = vpack.c.bf16 %v1095_v21, %v1092_v19  ;;  %v3252_v19 = vld [vmem:[#allocation10 + $0xc0] ss:$16 sps:$4 sm:$0xff]   ;;  %v3260_v21 = vld [vmem:[#allocation10 + $0xe4] ss:$16 sps:$4 sm:$0xff]  }
 0x50d   : > { %1629 = vmatmul.mubr.bf16.vlgmr.msra.gmra.mrb[4].mxu0 %v4046_v24  ;;  %1680 = vmatmul.mubr.bf16.vlgmr.msra.gmra.mrb[16].mxu1 %v4046_v24 }
 0x50e   : > { %2003 = vmatpush1.bf16.msra.mxu0 %v3168_v22  ;;  %2054 = vmatpush1.bf16.msra.mxu1 %v3171_v23  ;;  %v3263_v22 = vld [vmem:[#allocation10 + $0xec] ss:$16 sps:$4 sm:$0xff]   ;;  %v3258_v23 = vld [vmem:[#allocation10 + $0xe0] ss:$16 sps:$4 sm:$0xff]  }
 0x50f   : > { %2004 = vmatprep.subr.bf16.mxu0 %v3176_v25  ;;  %2055 = vmatprep.subr.bf16.mxu1 %v3179_v27  ;;  %v3261_v25 = vld [vmem:[#allocation10 + $0xe8] ss:$16 sps:$4 sm:$0xff]  }
 0x510   : > { %1638 = vmatprep.mubr.bf16.mxu0 %v3580_v11  ;;  %1689 = vmatprep.mubr.bf16.mxu1 %v3580_v11 }
 0x512   : > { %2005 = vmatpush1.bf16.msra.mxu0 %v3174_v28  ;;  %2056 = vmatpush1.bf16.msra.mxu1 %v3177_v36 }
 0x513   : > { %2006 = vmatprep.subr.bf16.mxu0 %v3182_v29  ;;  %2057 = vmatprep.subr.bf16.mxu1 %v3185_v30 }
 0x515   : > { %1639 = vmatmul.mubr.bf16.gmra.mrb[12].mxu0 %v4052_v33  ;;  %1690 = vmatmul.mubr.bf16.gmra.mrb[24].mxu1 %v4052_v33 }
 0x516   : > { %2007 = vmatpush1.bf16.msra.mxu0 %v3180_v31  ;;  %2058 = vmatpush1.bf16.msra.mxu1 %v3183_v32 }
 0x517   : > { %2008 = vmatprep.subr.bf16.mxu0 %v3188_v34  ;;  %2059 = vmatprep.subr.bf16.mxu1 %v3191_v35  ;;  %v1710_v35 = vsub.s32 2, %v3981_v26 }
 0x518   : > { %2034 = vmatprep.mubr.bf16.mxu0 %v3580_v11  ;;  %2085 = vmatprep.mubr.bf16.mxu1 %v3580_v11 }
 0x51a   : > { %2009 = vmatpush1.bf16.msra.mxu0 %v3186_v37  ;;  %2060 = vmatpush1.bf16.msra.mxu1 %v3189_v39  ;;  %v1714_v37 = vsub.s32 3, %v3981_v26 }
 0x51b   : > { %2010 = vmatprep.subr.bf16.mxu0 %v3194_v41  ;;  %2061 = vmatprep.subr.bf16.mxu1 %v3197_v42 }
 0x51e   : > { %2011 = vmatpush1.bf16.msra.mxu0 %v3192_v43  ;;  %2062 = vmatpush1.bf16.msra.mxu1 %v3195_v44 }
 0x51f   : > { %2012 = vmatprep.subr.bf16.mxu0 %v3200_v45  ;;  %2063 = vmatprep.subr.bf16.mxu1 %v3203_v46 }
 0x522   : > { %2013 = vmatpush1.bf16.msra.mxu0 %v3198_v47  ;;  %2064 = vmatpush1.bf16.msra.mxu1 %v3201_v49 }
 0x523   : > { %2014 = vmatprep.subr.bf16.mxu0 %v3206_v50  ;;  %2065 = vmatprep.subr.bf16.mxu1 %v3209_v52 }
 0x526   : > { %2015 = vmatpush1.bf16.msra.mxu0 %v3204_v51  ;;  %2066 = vmatpush1.bf16.msra.mxu1 %v3207_v53 }
 0x527   : > { %2016 = vmatprep.subr.bf16.mxu0 %v3212_v54  ;;  %2067 = vmatprep.subr.bf16.mxu1 %v3215_v55 }
 0x52a   : > { %2017 = vmatpush1.bf16.msra.mxu0 %v3210_v56  ;;  %2068 = vmatpush1.bf16.msra.mxu1 %v3213_v58 }
 0x52b   : > { %2264 = vmatprep.subr.bf16.mxu0 %v3218_v59  ;;  %2315 = vmatprep.subr.bf16.mxu1 %v3221_v60 }
 0x52d   : > { %2035 = vmatmul.mubr.bf16.vlgmr.msra.gmra.mrb[16].mxu0 %v4034_v48  ;;  %2086 = vmatmul.mubr.bf16.vlgmr.msra.gmra.mrb[28].mxu1 %v4034_v48  ;;  %v3239_v48 = vld [vmem:[#allocation10 + $0x6c] ss:$16 sps:$4 sm:$0xff]  }
 0x52e   : > { %2265 = vmatpush1.bf16.msra.mxu0 %v3216_v61  ;;  %2316 = vmatpush1.bf16.msra.mxu1 %v3219_v62 }
 0x52f   : > { %2266 = vmatprep.subr.bf16.mxu0 %v3224_v63  ;;  %2317 = vmatprep.subr.bf16.mxu1 %v3227_v38 }
 0x530   : > { %2044 = vmatprep.mubr.bf16.mxu0 %v3580_v11  ;;  %2095 = vmatprep.mubr.bf16.mxu1 %v3580_v11 }
 0x532   : > { %2267 = vmatpush1.bf16.msra.mxu0 %v3222_v0  ;;  %2318 = vmatpush1.bf16.msra.mxu1 %v3225_v1 }
 0x533   : > { %2268 = vmatprep.subr.bf16.mxu0 %v3230_v2  ;;  %2319 = vmatprep.subr.bf16.mxu1 %v3233_v3 }
 0x535   : > { %2045 = vmatmul.mubr.bf16.gmra.mrb[20].mxu0 %v4040_v57  ;;  %2096 = vmatmul.mubr.bf16.gmra.mrb[32].mxu1 %v4040_v57  ;;  %v3251_v57 = vld [vmem:[#allocation10 + $0xac] ss:$16 sps:$4 sm:$0xff]  }
 0x536   : > { %2269 = vmatpush1.bf16.msra.mxu0 %v3228_v4  ;;  %2320 = vmatpush1.bf16.msra.mxu1 %v3231_v5 }
 0x537   : > { %2270 = vmatprep.subr.bf16.mxu0 %v3236_v6  ;;  %2321 = vmatprep.subr.bf16.mxu1 %v3239_v48 }
 0x538   : > { %2296 = vmatprep.mubr.bf16.mxu0 %v3580_v11  ;;  %2347 = vmatprep.mubr.bf16.mxu1 %v3580_v11 }
 0x53a   : > { %2271 = vmatpush1.bf16.msra.mxu0 %v3234_v7  ;;  %2322 = vmatpush1.bf16.msra.mxu1 %v3237_v8 }
 0x53b   : > { %2272 = vmatprep.subr.bf16.mxu0 %v3242_v9  ;;  %2323 = vmatprep.subr.bf16.mxu1 %v3245_v10 }
 0x53e   : > { %2273 = vmatpush1.bf16.msra.mxu0 %v3240_v12  ;;  %2324 = vmatpush1.bf16.msra.mxu1 %v3243_v13 }
 0x53f   : > { %2274 = vmatprep.subr.bf16.mxu0 %v3248_v14  ;;  %2325 = vmatprep.subr.bf16.mxu1 %v3251_v57 }
 0x542   : > { %2275 = vmatpush1.bf16.msra.mxu0 %v3246_v15  ;;  %2326 = vmatpush1.bf16.msra.mxu1 %v3249_v16 }
 0x543   : > { %2276 = vmatprep.subr.bf16.mxu0 %v3254_v17  ;;  %2327 = vmatprep.subr.bf16.mxu1 %v3257_v18 }
 0x546   : > { %2277 = vmatpush1.bf16.msra.mxu0 %v3252_v19  ;;  %2328 = vmatpush1.bf16.msra.mxu1 %v3255_v20 }
 0x547   : > { %2278 = vmatprep.subr.bf16.mxu0 %v3260_v21  ;;  %2329 = vmatprep.subr.bf16.mxu1 %v3263_v22 }
 0x54a   : > { %2279 = vmatpush1.bf16.msra.mxu0 %v3258_v23  ;;  %2330 = vmatpush1.bf16.msra.mxu1 %v3261_v25 }
 0x54d   : > { %2297 = vmatmul.mubr.bf16.vlgmr.msra.gmra.mrb[16].mxu0 %v4046_v24  ;;  %2348 = vmatmul.mubr.bf16.vlgmr.msra.gmra.mrb[28].mxu1 %v4046_v24  ;;  %v1698_v24 = vld [vmem:[%s4241_s17] sm:$0xf]  ;;  %s3464_s17 = scalar_lea.vmem %s3463_s2, 1536 }
 0x54e   : > { %2306 = vmatprep.mubr.bf16.mxu0 %v3580_v11  ;;  %2357 = vmatprep.mubr.bf16.mxu1 %v3580_v11  ;;  %v1706_v11 = vsub.s32 1, %v3981_v26  ;;  %v1711_v39 = vrot.slane %v1698_v24, %v1710_v35  ;;  %v1715_v42 = vrot.slane %v1698_v24, %v1714_v37  ;;  %p3466_p2 = scmp.lt.s32.totalorder %s3464_s17, %s3458_s22 }
 0x550   : > { %v1707_v41 = vrot.slane %v1698_v24, %v1706_v11  ;;  %p3467_p3 = por %p3466_p2, %p3465_p0 }
 0x552   : > { %p3468_p6 = pnand %p3467_p3, %p3461_p13 }
 0x555   : > { %2307 = vmatmul.mubr.bf16.gmra.mrb[24].mxu0 %v4052_v33  ;;  %2358 = vmatmul.mubr.bf16.gmra.mrb[36].mxu1 %v4052_v33  ;;  %v1703_v33 = vrot.slane %v1698_v24, %v4001_v40 }
 0x5a4   : > { %v1378_v27 = vpop.f32.mrb[8].mxu0  ;;  %v1429_v28 = vpop.f32.mrb[20].mxu1 }
 0x5a5   : > { %v1380_v36 = vpop.f32.mrb[9].mxu0  ;;  %v1431_v29 = vpop.f32.mrb[21].mxu1 }
 0x5a6   : > { %v1382_v30 = vpop.f32.mrb[10].mxu0  ;;  %v1433_v31 = vpop.f32.mrb[22].mxu1 }
 0x5a7   : > { %v1383_v32 = vpop.f32.mrb[11].mxu0  ;;  %v1434_v34 = vpop.f32.mrb[23].mxu1 }
 0x5e0   : > { %v1630_v43 = vpop.f32.mrb[4].mxu0  ;;  %v1681_v44 = vpop.f32.mrb[16].mxu1 }
 0x5e1   : > { %v1720_v45 = vadd.f32 %v1703_v33, %v1630_v43  ;;  %v1722_v46 = vadd.f32 %v1711_v39, %v1681_v44  ;;  %v1632_v47 = vpop.f32.mrb[5].mxu0  ;;  %v1683_v49 = vpop.f32.mrb[17].mxu1 }
 0x5e2   : > { %v1721_v50 = vadd.f32 %v1707_v41, %v1632_v47  ;;  %v1723_v52 = vadd.f32 %v1715_v42, %v1683_v49  ;;  %v1634_v51 = vpop.f32.mrb[6].mxu0  ;;  %v1685_v53 = vpop.f32.mrb[18].mxu1 }
 0x5e3   : > { %v1724_v54 = vadd.f32 %v1703_v33, %v1634_v51  ;;  %v1726_v55 = vadd.f32 %v1711_v39, %v1685_v53  ;;  %v1636_v56 = vpop.f32.mrb[7].mxu0  ;;  %v1687_v58 = vpop.f32.mrb[19].mxu1 }
 0x5e4   : > { %v2849_v59 = vpack.c.bf16 %v1721_v50, %v1720_v45  ;;  %v2850_v60 = vpack.c.bf16 %v1723_v52, %v1722_v46  ;;  %v1725_v61 = vadd.f32 %v1707_v41, %v1636_v56  ;;  %v1727_v62 = vadd.f32 %v1715_v42, %v1687_v58 }
 0x5e6   : > { %1772 = vst [vmem:[%s599_s27] sm:$0xff] %v2849_v59  ;;  %1773 = vst [vmem:[%s599_s27 + $0x8] sm:$0xff] %v2850_v60  ;;  %v2851_v63 = vpack.c.bf16 %v1725_v61, %v1724_v54  ;;  %v2852_v38 = vpack.c.bf16 %v1727_v62, %v1726_v55 }
 0x5e8   : > { %1774 = vst [vmem:[%s599_s27 + $0x10] sm:$0xff] %v2851_v63  ;;  %1775 = vst [vmem:[%s599_s27 + $0x18] sm:$0xff] %v2852_v38  ;;  %v1640_v0 = vpop.f32.mrb[12].mxu0  ;;  %v1691_v1 = vpop.f32.mrb[24].mxu1 }
 0x5e9   : > { %v1641_v2 = vadd.f32 %v1640_v0, %v1378_v27  ;;  %v1692_v3 = vadd.f32 %v1691_v1, %v1429_v28  ;;  %v1642_v4 = vpop.f32.mrb[13].mxu0  ;;  %v1693_v5 = vpop.f32.mrb[25].mxu1 }
 0x5ea   : > { %v1643_v6 = vadd.f32 %v1642_v4, %v1380_v36  ;;  %v1694_v48 = vadd.f32 %v1693_v5, %v1431_v29  ;;  %v1644_v7 = vpop.f32.mrb[14].mxu0  ;;  %v1695_v8 = vpop.f32.mrb[26].mxu1 }
 0x5eb   : > { %v1728_v9 = vadd.f32 %v1703_v33, %v1641_v2  ;;  %v1730_v10 = vadd.f32 %v1711_v39, %v1692_v3  ;;  %v1645_v12 = vpop.f32.mrb[15].mxu0  ;;  %v1696_v13 = vpop.f32.mrb[27].mxu1 }
 0x5ec   : > { %v1729_v14 = vadd.f32 %v1707_v41, %v1643_v6  ;;  %v1731_v57 = vadd.f32 %v1715_v42, %v1694_v48 }
 0x5ee   : > { %v2853_v15 = vpack.c.bf16 %v1729_v14, %v1728_v9  ;;  %v2854_v16 = vpack.c.bf16 %v1731_v57, %v1730_v10 }
 0x5f0   : > { %1776 = vst [vmem:[%s599_s27 + $0x20] sm:$0xff] %v2853_v15  ;;  %1777 = vst [vmem:[%s599_s27 + $0x28] sm:$0xff] %v2854_v16 }
 0x5f1   : > { %3471 = shalt.err (!%p3468_p6)
}
 0x5f2   : > { %s3472_s27 = scalar_lea.hbm %s4096_s18, 768  ;;  %s3476_s14 = scalar_lea.hbm %s4242_s8, 1536 }
 0x5f3   : > { %p3473_p11 = scmp.ne.s32.totalorder %s4096_s18, %s3472_s27  ;;  %p3477_p5 = scmp.lt.u32.totalorder %s4096_s18, %s4242_s8 }
 0x5f4   : > { %p3478_p9 = scmp.lt.u32.totalorder %s3476_s14, %s3472_s27  ;;  %p3480_p10 = scmp.lt.u32.totalorder %s3472_s27, %s4096_s18 }
 0x5f5   : > { %p3474_p12 = pnand %p3473_p11, %p4243_p4 }
 0x5f6   : > { %p3479_p7 = por %p3478_p9, %p3477_p5 }
 0x5f7   : > { %p3475_p8 = pneg %p3474_p12 }
 0x5f8   : > { %p3481_p1 = por %p3480_p10, %p3479_p7 }
 0x5fa   : > { %p3482_p13 = pnand %p3481_p1, %p3475_p8 }
 0x5fc   : > { %3485 = shalt.err (!%p3482_p13)
}
 0x5fd   : > { %s4212_s22 = smov 256   ;;  %s4213_s17 = smov 16  }
 0x5fe   : > { %2971 = dma.vmem_to_hbm [thread:$0]  (%p4243_p4), %s4089_s6, 768, %s4096_s18, %s2447_s13, %s4212_s22, %s4212_s22, %s4213_s17  }
 0x5ff   : > { %s4244_s26 = sld [smem:[#allocation26_spill]]  ;;  %s606_s6 = scalar_lea.vmem [#allocation14], %s2944_s20 }
 0x600   : > { %s2481_s18 = sshll.u32 %s606_s6, 4  ;;  %s4245_s20 = smul.u32 768, %s3682_s19  ;;  %s4137_s18 = int_to_ptr.vmem [resolvable:$true] %s2481_s18 }
 0x601   : > { %s4246_s14 = sld [smem:[#allocation28_spill]]  ;;  %s2452_s28 = scalar_lea.sflag [#allocation15], %s3902_s23 }
 0x602   : > { %s3486_s27 = scalar_lea.vmem %s4137_s18, 768 }
 0x603   : > { %p3487_p0 = scmp.ne.s32.totalorder %s4137_s18, %s3486_s27 }
 0x605   : > { %v2366_v27 = vld [vmem:[%s4244_s26] sm:$0xf]  ;;  %p3488_p2 = pnand %p3487_p0, %p4243_p4  ;;  %s3585_s26 = smov [#allocation14]  }
 0x606   : > { %v2371_v28 = vrot.slane %v2366_v27, %v4001_v40  ;;  %v2379_v36 = vrot.slane %v2366_v27, %v1710_v35  ;;  %v2375_v29 = vrot.slane %v2366_v27, %v1706_v11  ;;  %v2383_v30 = vrot.slane %v2366_v27, %v1714_v37  ;;  %s3490_s22 = sshll.u32 %s3585_s26, 4  ;;  %s3491_s22 = int_to_ptr.vmem [resolvable:$false] %s3490_s22 }
 0x607   : > { %s4144_s2 = scalar_lea.hbm %s4246_s14, %s4245_s20  ;;  %p3489_p3 = pneg %p3488_p2 }
 0x608   : > { %v2046_v17 = vpop.f32.mrb[20].mxu0  ;;  %v2097_v18 = vpop.f32.mrb[32].mxu1  ;;  %s3492_s17 = scalar_lea.vmem %s3491_s22, 1536  ;;  %p3493_p6 = scmp.lt.s32.totalorder %s4137_s18, %s3491_s22 }
 0x609   : > { %v2048_v19 = vpop.f32.mrb[21].mxu0  ;;  %v2099_v20 = vpop.f32.mrb[33].mxu1  ;;  %p3494_p11 = scmp.lt.s32.totalorder %s3492_s17, %s3486_s27 }
 0x60a   : > { %v2050_v21 = vpop.f32.mrb[22].mxu0  ;;  %v2101_v22 = vpop.f32.mrb[34].mxu1 }
 0x60b   : > { %v2051_v23 = vpop.f32.mrb[23].mxu0  ;;  %v2102_v25 = vpop.f32.mrb[35].mxu1  ;;  %p3495_p12 = por %p3494_p11, %p3493_p6 }
 0x60d   : > { %p3496_p8 = pnand %p3495_p12, %p3489_p3 }
 0x620   : > { %v2298_v31 = vpop.f32.mrb[16].mxu0  ;;  %v2349_v32 = vpop.f32.mrb[28].mxu1 }
 0x621   : > { %v2388_v34 = vadd.f32 %v2371_v28, %v2298_v31  ;;  %v2390_v24 = vadd.f32 %v2379_v36, %v2349_v32  ;;  %v2300_v33 = vpop.f32.mrb[17].mxu0  ;;  %v2351_v39 = vpop.f32.mrb[29].mxu1 }
 0x622   : > { %v2389_v41 = vadd.f32 %v2375_v29, %v2300_v33  ;;  %v2391_v42 = vadd.f32 %v2383_v30, %v2351_v39  ;;  %v2302_v43 = vpop.f32.mrb[18].mxu0  ;;  %v2353_v40 = vpop.f32.mrb[30].mxu1 }
 0x623   : > { %v2392_v44 = vadd.f32 %v2371_v28, %v2302_v43  ;;  %v2394_v45 = vadd.f32 %v2379_v36, %v2353_v40  ;;  %v2304_v35 = vpop.f32.mrb[19].mxu0  ;;  %v2355_v46 = vpop.f32.mrb[31].mxu1 }
 0x624   : > { %v2855_v47 = vpack.c.bf16 %v2389_v41, %v2388_v34  ;;  %v2856_v11 = vpack.c.bf16 %v2391_v42, %v2390_v24  ;;  %v2393_v49 = vadd.f32 %v2375_v29, %v2304_v35  ;;  %v2395_v26 = vadd.f32 %v2383_v30, %v2355_v46 }
 0x626   : > { %2440 = vst [vmem:[%s606_s6] sm:$0xff] %v2855_v47  ;;  %2441 = vst [vmem:[%s606_s6 + $0x8] sm:$0xff] %v2856_v11  ;;  %v2857_v37 = vpack.c.bf16 %v2393_v49, %v2392_v44  ;;  %v2858_v50 = vpack.c.bf16 %v2395_v26, %v2394_v45 }
 0x628   : > { %2442 = vst [vmem:[%s606_s6 + $0x10] sm:$0xff] %v2857_v37  ;;  %2443 = vst [vmem:[%s606_s6 + $0x18] sm:$0xff] %v2858_v50  ;;  %v2308_v52 = vpop.f32.mrb[24].mxu0  ;;  %v2359_v51 = vpop.f32.mrb[36].mxu1 }
 0x629   : > { %v2309_v53 = vadd.f32 %v2308_v52, %v2046_v17  ;;  %v2360_v54 = vadd.f32 %v2359_v51, %v2097_v18  ;;  %v2310_v55 = vpop.f32.mrb[25].mxu0  ;;  %v2361_v56 = vpop.f32.mrb[37].mxu1 }
 0x62a   : > { %v2311_v58 = vadd.f32 %v2310_v55, %v2048_v19  ;;  %v2362_v59 = vadd.f32 %v2361_v56, %v2099_v20  ;;  %v2312_v60 = vpop.f32.mrb[26].mxu0  ;;  %v2363_v61 = vpop.f32.mrb[38].mxu1 }
 0x62b   : > { %v2396_v62 = vadd.f32 %v2371_v28, %v2309_v53  ;;  %v2398_v63 = vadd.f32 %v2379_v36, %v2360_v54  ;;  %v2313_v38 = vpop.f32.mrb[27].mxu0  ;;  %v2364_v0 = vpop.f32.mrb[39].mxu1 }
 0x62c   : > { %v2397_v1 = vadd.f32 %v2375_v29, %v2311_v58  ;;  %v2399_v2 = vadd.f32 %v2383_v30, %v2362_v59 }
 0x62e   : > { %v2859_v3 = vpack.c.bf16 %v2397_v1, %v2396_v62  ;;  %v2860_v4 = vpack.c.bf16 %v2399_v2, %v2398_v63 }
 0x630   : > { %2444 = vst [vmem:[%s606_s6 + $0x20] sm:$0xff] %v2859_v3  ;;  %2445 = vst [vmem:[%s606_s6 + $0x28] sm:$0xff] %v2860_v4 }
 0x631   : > { %3499 = shalt.err (!%p3496_p8)
}
 0x632   : > { %s3500_s19 = scalar_lea.hbm %s4144_s2, 768  ;;  %s3504_s13 = scalar_lea.hbm %s4246_s14, 1536 }
 0x633   : > { %p3501_p5 = scmp.ne.s32.totalorder %s4144_s2, %s3500_s19  ;;  %p3505_p10 = scmp.lt.u32.totalorder %s4144_s2, %s4246_s14 }
 0x634   : > { %p3506_p1 = scmp.lt.u32.totalorder %s3504_s13, %s3500_s19  ;;  %p3508_p0 = scmp.lt.u32.totalorder %s3500_s19, %s4144_s2 }
 0x635   : > { %p3502_p9 = pnand %p3501_p5, %p4243_p4 }
 0x636   : > { %p3507_p13 = por %p3506_p1, %p3505_p10 }
 0x637   : > { %p3503_p7 = pneg %p3502_p9 }
 0x638   : > { %p3509_p2 = por %p3508_p0, %p3507_p13 }
 0x63a   : > { %p3510_p3 = pnand %p3509_p2, %p3503_p7 }
 0x63c   : > { %3513 = shalt.err (!%p3510_p3)
}
 0x63d   : > { %s4247_s17 = smov 16   ;;  %s4248_s27 = smov 256  }
 0x63e   : > { %2972 = dma.vmem_to_hbm [thread:$0]  (%p4243_p4), %s4137_s18, 768, %s4144_s2, %s2452_s28, %s4248_s27, %s4248_s27, %s4247_s17  }
 0x63f PF: > { %s2496_s26 = sand.u32 1, %s3556_s29   ;;  %p4249_p6 = scmp.ne.s32.totalorder %s4229_s24, 0 }
 0x640   : > { %p4250_p11 = scmp.ge.s32.totalorder %s3568_s16, 2  ;;  %s2497_s19 = scalar_lea.sflag [#allocation4], %s2496_s26 }
 0x642   : > { %p2996_p12 = pnand %p4250_p11, %p4249_p6 }
 0x644   : > { %3547 = dma.done.wait (!%p2996_p12), %s2497_s19, 768  }
 0x645   : > { %3549 = vsyncadd (!%p2996_p12), %s2497_s19, 4294966528  ;;  %s2506_s9 = scalar_lea.sflag [#allocation15], %s2496_s26 }
 0x646   : > { %3551 = dma.done.wait (!%p2996_p12), %s2506_s9, 768  }
 0x647   : > { %3553 = vsyncadd (!%p2996_p12), %s2506_s9, 4294966528  ;;  %p34_p4 = scmp.ge.s32.totalorder %s3832_s21, 4   ;;  %s4251_s29 = smov %s3560_s30 }
 0x648   : > { %s4252_s30 = smov %s3564_s15  ;;  %s4253_s15 = smov %s3844_s12 }
 0x649   : > { %s4254_s16 = smov %s3832_s21  ;;  %36 = sbr.rel (!%p34_p4) target bundleno = 18 (0x12), region = 163 }
 0x650   :  { %2511 = vsyncpa [#allocation3], 1 }
 0x651   :  { %2513 = vsyncpa [#allocation3 + $0x1], 1 }
 0x652   :  { %2514 = vsyncpa [#allocation6], 1 }
 0x653   :  { %2515 = vsyncpa [#allocation9], 1 }
 0x654   :  { %2516 = vsyncpa [#allocation12], 1 }
 0x655   :  { %2517 = vsyncpa [#allocation4], 1 }
 0x656   :  { %2519 = vsyncpa [#allocation4 + $0x1], 1 }
 0x657   :  { %2520 = vsyncpa [#allocation15], 1 }
 0x658   :  { %2522 = vsyncpa [#allocation15 + $0x1], 1 }

</bundles_post_ra>
